<compile_context>
chip_gen: v7x
topology: tpu7x:2x2x1
jax: 0.10.0
libtpu: 0.0.40
codegen_flags: <defaults>
</compile_context>

<pallas_src>
import jax
import jax.numpy as jnp
from jax.experimental import pallas as pl
from jax.experimental.pallas import tpu as pltpu


# --------------------------------------------------------------------------- #
# Kernel
# --------------------------------------------------------------------------- #
def _coord_att_conv_kernel(x_ref, bmat_ref, t1_ref, pw_ref,
                           wemb_ref, bemb_ref, wah_ref, bah_ref,
                           wembblk_ref, bembw_ref, wawblk_ref, baw_ref,
                           o_ref, xs_ref):
    B, H, WCin = x_ref.shape
    WCout = o_ref.shape[2]
    cdt = xs_ref.dtype                       # MXU operand dtype (bf16 or f32)

    # ---- build the stacked-tap conv operand (single fused-K matmul) --------
    # xs lanes: [0,WCin)        = input row h-1  (kh=0 tap, zero at h=0)
    #           [WCin,2*WCin)   = input row h    (kh=1 tap)
    #           [2*WCin,3*WCin) = input row h+1  (kh=2 tap, zero at h=H-1)
    x = x_ref[...].astype(cdt)                                    # (B, H, WCin)
    zrow = jnp.zeros((B, 1, WCin), cdt)
    xs_ref[:, :, WCin:2 * WCin] = x
    xs_ref[:, 1:H, 0:WCin] = x[:, 0:H - 1, :]
    xs_ref[:, 0:1, 0:WCin] = zrow
    xs_ref[:, 0:H - 1, 2 * WCin:3 * WCin] = x[:, 1:H, :]
    xs_ref[:, H - 1:H, 2 * WCin:3 * WCin] = zrow

    # ---- 3x3 conv + BN(eval) + ReLU: (B*H, 3*W*Cin) @ (3*W*Cin, W*Cout) ----
    # The band structure of bmat encodes the kw taps + W-boundary zero padding
    # and lands the conv output lane-dense as (rows, w*Cout + c).
    a = xs_ref[...].reshape(B * H, 3 * WCin)
    cflat = jnp.maximum(
        jnp.dot(a, bmat_ref[...], preferred_element_type=jnp.float32)
        + t1_ref[...], 0.0)                                       # (B*H, W*Cout) f32
    c3 = cflat.reshape(B, H, WCout)

    # ---- coordinate pooling --------------------------------------------------
    # mean over w as an MXU matmul (1/W folded into pw); mean over h as a
    # sublane reduction with the 1/H divisor as one scalar multiply.
    pool_h = jnp.dot(cflat.astype(cdt), pw_ref[...],
                     preferred_element_type=jnp.float32)          # (B*H, Cout)
    pool_w = (jnp.sum(c3, axis=1) * (1.0 / H)).astype(cdt)        # (B, W*Cout)

    # ---- H branch: shared 1x1 emb (+BN+SiLU), then att_h (+sigmoid) ---------
    # TODO(synk): this branch is lane-sparse (Cout=8 / mip=4 lanes); acceptable
    #             at this size, restructure as an H-kron (like the W branch)
    #             if it ever becomes the VALU/EUP bottleneck.
    z_h = jnp.dot(pool_h.astype(cdt), wemb_ref[...],
                  preferred_element_type=jnp.float32) + bemb_ref[...]
    e_h = z_h * jax.nn.sigmoid(z_h)                               # SiLU, (B*H, mip)
    a_h = jax.nn.sigmoid(
        jnp.dot(e_h.astype(cdt), wah_ref[...],
                preferred_element_type=jnp.float32) + bah_ref[...])   # (B*H, W*Cout)

    # ---- W branch: block-diagonal (kron) weights keep (w, feat) lanes dense -
    z_w = jnp.dot(pool_w, wembblk_ref[...],
                  preferred_element_type=jnp.float32) + bembw_ref[...]
    e_w = z_w * jax.nn.sigmoid(z_w)                               # (B, W*mip)
    a_w = jax.nn.sigmoid(
        jnp.dot(e_w.astype(cdt), wawblk_ref[...],
                preferred_element_type=jnp.float32) + baw_ref[...])   # (B, W*Cout)

    out = c3 * a_h.reshape(B, H, WCout) * a_w[:, None, :]
    o_ref[...] = out.astype(o_ref.dtype)


# --------------------------------------------------------------------------- #
# Wrapper helpers
# --------------------------------------------------------------------------- #
def _fold_params(p, W, cdt):
    """Fold eval-mode BN + pooling divisors into banded / kron weight matrices."""
    eps = 1e-5
    f32 = jnp.float32
    Cout, Cin = p['conv_w'].shape[0], p['conv_w'].shape[1]
    mip = p['emb_w'].shape[0]

    # conv + BN1 folding; fused-K banded weight with W-boundary padding encoded.
    s1 = p['bn1_gamma'] / jnp.sqrt(p['bn1_var'] + eps)
    t1 = (p['conv_b'] - p['bn1_mean']) * s1 + p['bn1_beta']
    wk = jnp.transpose(p['conv_w'] * s1[:, None, None, None], (2, 3, 1, 0))  # (3,3,Cin,Cout)
    delta = jnp.arange(W)[:, None] - jnp.arange(W)[None, :]                  # wi - wo
    sel = jnp.stack([(delta == k - 1) for k in range(3)], 0).astype(f32)     # (3, W, W)
    bmat = jnp.einsum('kij,hkco->hicjo', sel, wk).reshape(3 * W * Cin, W * Cout)

    # mean-over-w pooling matrix (1/W divisor folded in).
    pw = jnp.tile(jnp.eye(Cout, dtype=f32), (W, 1)) / W                      # (W*Cout, Cout)

    # shared 1x1 embedding conv + BN(eval).
    se = p['bne_gamma'] / jnp.sqrt(p['bne_var'] + eps)
    wemb = (p['emb_w'][:, :, 0, 0] * se[:, None]).T                          # (Cout, mip)
    bemb = (p['emb_b'] - p['bne_mean']) * se + p['bne_beta']
    wemb_blk = jnp.kron(jnp.eye(W, dtype=f32), wemb)                         # (W*Cout, W*mip)

    # attention heads.
    wah = p['atth_w'][:, :, 0, 0].T                                          # (mip, Cout)
    waw = p['attw_w'][:, :, 0, 0].T                                          # (mip, Cout)
    waw_blk = jnp.kron(jnp.eye(W, dtype=f32), waw)                           # (W*mip, W*Cout)

    return dict(
        bmat=bmat.astype(cdt),
        t1=jnp.tile(t1, W).reshape(1, W * Cout),
        pw=pw.astype(cdt),
        wemb=wemb.astype(cdt),
        bemb=bemb.reshape(1, mip),
        wah=jnp.tile(wah, (1, W)).astype(cdt),                               # (mip, W*Cout)
        bah=jnp.tile(p['atth_b'], W).reshape(1, W * Cout),
        wembblk=wemb_blk.astype(cdt),
        bembw=jnp.tile(bemb, W).reshape(1, W * mip),
        wawblk=waw_blk.astype(cdt),
        baw=jnp.tile(p['attw_b'], W).reshape(1, W * Cout),
    )


def _default_min_grid_steps():
    # v7x has two TensorCores per chip: keep the ("parallel",) batch grid axis
    # at >= 2 steps so both cores get work.  v5e / v6e have a single TC.
    try:
        kind = jax.devices()[0].device_kind.lower()
    except Exception:
        return 1
    return 2 if "v7" in kind else 1


def _pick_batch_block(n, cap, min_grid_steps):
    # TODO(synk): if N is prime and > cap this degrades to B_blk=1 (correct but
    #             many tiny steps); pad N in the caller if that ever matters.
    cap = max(1, min(cap, n))
    if min_grid_steps > 1 and n >= min_grid_steps:
        cap = max(1, min(cap, n // min_grid_steps))
    for b in range(cap, 0, -1):
        if n % b == 0:
            return b
    return 1


def _padded_vmem_bytes(shape, dtype):
    shape = tuple(int(d) for d in shape)
    if len(shape) == 1:
        shape = (1,) + shape
    lead = 1
    for d in shape[:-2]:
        lead *= d
    sub = -(-shape[-2] // 8) * 8
    lane = -(-shape[-1] // 128) * 128
    return lead * sub * lane * jnp.dtype(dtype).itemsize


# --------------------------------------------------------------------------- #
# Entry points
# --------------------------------------------------------------------------- #
def coord_attention_conv_rows(x_rows, p, *, use_bf16=True, max_batch_block=None,
                              min_grid_steps=None, single_buffer_weights=True):
    """Rows-layout entry point: x_rows is (N, H, W*Cin) with channels fastest in
    lanes, returns (N, H, W*Cout).  Call this directly from NHWC-style
    consumers to skip the NCHW<->rows transposes of `coord_attention_conv`."""
    N, H, WCin = x_rows.shape
    Cout, Cin = p['conv_w'].shape[0], p['conv_w'].shape[1]
    mip = p['emb_w'].shape[0]
    assert WCin % Cin == 0
    W = WCin // Cin
    WCout = W * Cout

    cdt = jnp.bfloat16 if use_bf16 else jnp.float32
    mats = _fold_params(p, W, cdt)

    # Scaling guard: band / kron weights are O(W^2 * C) -- the first thing to
    # blow v7x's 64 MiB VMEM.
    # TODO(synk): switch to a tiled-H / explicit-kw formulation instead of the
    #             materialized band/kron weights once W*C exceeds ~2K lanes.
    if max(3 * WCin, WCout, W * mip) > 2048:
        raise NotImplementedError(
            "W*Cin / W*Cout too large for the materialized band/kron weights; "
            "use a tiled-H formulation.")

    if min_grid_steps is None:
        min_grid_steps = _default_min_grid_steps()
    if max_batch_block is None:
        # Target M = B_blk*H ~ 256 MXU rows per step (v6e/v7x fill) while still
        # amortizing the ~0.35us per-grid-step overhead on v5e/v6e.
        max_batch_block = max(8, min(64, -(-256 // H)))
    B_blk = _pick_batch_block(N, max_batch_block, min_grid_steps)

    wfactor = 1 if single_buffer_weights else 2
    est = (2 * _padded_vmem_bytes((B_blk, H, WCin), x_rows.dtype)
           + 2 * _padded_vmem_bytes((B_blk, H, WCout), x_rows.dtype)
           + _padded_vmem_bytes((B_blk, H, 3 * WCin), cdt)
           + wfactor * sum(_padded_vmem_bytes(a.shape, a.dtype)
                           for a in mats.values()))
    if est > 100 * 1024 * 1024:
        raise ValueError(
            f"estimated VMEM per grid step ({est} bytes) too large; "
            "reduce max_batch_block.")
    vmem_limit = max(32 * 1024 * 1024, int(1.5 * est))

    def wspec(a):
        nd = a.ndim
        imap = lambda n, _nd=nd: (0,) * _nd
        if single_buffer_weights:
            # grid-invariant weights: no point double-buffering them.
            return pl.BlockSpec(a.shape, imap, pipeline_mode=pl.Buffered(1))
        return pl.BlockSpec(a.shape, imap)

    order = ('bmat', 't1', 'pw', 'wemb', 'bemb', 'wah', 'bah',
             'wembblk', 'bembw', 'wawblk', 'baw')

    return pl.pallas_call(
        _coord_att_conv_kernel,
        out_shape=jax.ShapeDtypeStruct((N, H, WCout), x_rows.dtype),
        grid_spec=pltpu.PrefetchScalarGridSpec(
            num_scalar_prefetch=0,
            grid=(N // B_blk,),
            in_specs=[pl.BlockSpec((B_blk, H, WCin), lambda n: (n, 0, 0))]
                     + [wspec(mats[k]) for k in order],
            out_specs=pl.BlockSpec((B_blk, H, WCout), lambda n: (n, 0, 0)),
            scratch_shapes=[pltpu.VMEM((B_blk, H, 3 * WCin), cdt)],
        ),
        compiler_params=pltpu.CompilerParams(
            dimension_semantics=("parallel",),
            vmem_limit_bytes=vmem_limit),
    )(x_rows, *[mats[k] for k in order])


def coord_attention_conv(x_nchw, p, **kwargs):
    """NCHW in / NCHW out (PyTorch-compatible interface).
    TODO(synk): the two transposes below roughly double HBM traffic at demo
    size; call coord_attention_conv_rows directly if the surrounding model can
    consume the (N, H, W*C) rows layout."""
    N, Cin, H, W = x_nchw.shape
    Cout = p['conv_w'].shape[0]
    x_rows = jnp.transpose(x_nchw, (0, 2, 3, 1)).reshape(N, H, W * Cin)
    out_rows = coord_attention_conv_rows(x_rows, p, **kwargs)
    return jnp.transpose(out_rows.reshape(N, H, W, Cout), (0, 3, 1, 2))


# --------------------------------------------------------------------------- #
# Plain-JAX reference (eval-mode PyTorch semantics) + params
# --------------------------------------------------------------------------- #
def reference_forward(x, p):
    eps = 1e-5
    y = jax.lax.conv_general_dilated(
        x, p['conv_w'], window_strides=(1, 1), padding=((1, 1), (1, 1)),
        dimension_numbers=('NCHW', 'OIHW', 'NCHW'))
    y = y + p['conv_b'][None, :, None, None]
    y = ((y - p['bn1_mean'][None, :, None, None])
         / jnp.sqrt(p['bn1_var'] + eps)[None, :, None, None]
         * p['bn1_gamma'][None, :, None, None] + p['bn1_beta'][None, :, None, None])
    y = jnp.maximum(y, 0.0)
    N, C, H, W = y.shape
    ph = jnp.mean(y, axis=3, keepdims=True)                                   # (N,C,H,1)
    pw = jnp.transpose(jnp.mean(y, axis=2, keepdims=True), (0, 1, 3, 2))      # (N,C,W,1)
    cd = jnp.concatenate([pw, ph], axis=2)                                    # (N,C,W+H,1)
    we = p['emb_w'][:, :, 0, 0]
    z = jnp.einsum('mc,nchw->nmhw', we, cd) + p['emb_b'][None, :, None, None]
    z = ((z - p['bne_mean'][None, :, None, None])
         / jnp.sqrt(p['bne_var'] + eps)[None, :, None, None]
         * p['bne_gamma'][None, :, None, None] + p['bne_beta'][None, :, None, None])
    z = z * jax.nn.sigmoid(z)
    cd_w, cd_h = z[:, :, :W, :], z[:, :, W:, :]
    cd_w = jnp.transpose(cd_w, (0, 1, 3, 2))                                  # (N,mip,1,W)
    a_h = jax.nn.sigmoid(jnp.einsum('om,nmhw->nohw', p['atth_w'][:, :, 0, 0], cd_h)
                         + p['atth_b'][None, :, None, None])                  # (N,Cout,H,1)
    a_w = jax.nn.sigmoid(jnp.einsum('om,nmhw->nohw', p['attw_w'][:, :, 0, 0], cd_w)
                         + p['attw_b'][None, :, None, None])                  # (N,Cout,1,W)
    return y * (a_h * a_w)


def init_params(key, Cin, Cout, att_reduction=8):
    mip = max(4, Cout // att_reduction)
    ks = jax.random.split(key, 16)
    n = lambda k, s, sc: sc * jax.random.normal(k, s, jnp.float32)
    return {
        'conv_w': n(ks[0], (Cout, Cin, 3, 3), 0.2),
        'conv_b': n(ks[1], (Cout,), 0.1),
        'bn1_gamma': 1.0 + n(ks[2], (Cout,), 0.1),
        'bn1_beta': n(ks[3], (Cout,), 0.1),
        'bn1_mean': n(ks[4], (Cout,), 0.1),
        'bn1_var': 0.5 + jnp.abs(n(ks[5], (Cout,), 0.2)),
        'emb_w': n(ks[6], (mip, Cout, 1, 1), 0.3),
        'emb_b': n(ks[7], (mip,), 0.1),
        'bne_gamma': 1.0 + n(ks[8], (mip,), 0.1),
        'bne_beta': n(ks[9], (mip,), 0.1),
        'bne_mean': n(ks[10], (mip,), 0.1),
        'bne_var': 0.5 + jnp.abs(n(ks[11], (mip,), 0.2)),
        'atth_w': n(ks[12], (Cout, mip, 1, 1), 0.3),
        'atth_b': n(ks[13], (Cout,), 0.1),
        'attw_w': n(ks[14], (Cout, mip, 1, 1), 0.3),
        'attw_b': n(ks[15], (Cout,), 0.1),
    }


if __name__ == "__main__":
    # CoordAttentionConv(in_channels=4, out_channels=8, att_reduction=8)
    N, Cin, H, W = 2, 4, 16, 16
    Cout = 8
    key = jax.random.PRNGKey(0)
    kx, kp = jax.random.split(key)
    x = jax.random.normal(kx, (N, Cin, H, W), jnp.float32)
    params = init_params(kp, Cin, Cout, att_reduction=8)

    ref = reference_forward(x, params)

    def run(use_bf16):
        def call(single_buffer):
            f = jax.jit(lambda xx: coord_attention_conv(
                xx, params, use_bf16=use_bf16,
                single_buffer_weights=single_buffer))
            out = f(x)
            jax.block_until_ready(out)
            return out
        try:
            return call(True)
        except Exception:
            # Fallback for jax builds where pl.Buffered(1) on a top-level
            # pallas_call BlockSpec is not supported: double-buffer weights.
            return call(False)

    # Exact f32 path (semantics check).
    out32 = run(False)
    err32 = float(jnp.max(jnp.abs(out32 - ref)))
    assert err32 < 1e-3, f"f32 max abs error {err32}"

    # bf16 MXU path (default).
    out16 = run(True)
    rel16 = float(jnp.max(jnp.abs(out16 - ref) / (jnp.abs(ref) + 1.0)))
    assert rel16 < 5e-2, f"bf16 max rel error {rel16}"

    print("KERNEL_OK")
</pallas_src>

<mosaic_0001>
module attributes {stable_mosaic.version = 11 : i64} {
  func.func @_coord_att_conv_kernel(%arg0: i32, %arg1: memref<2x16x64xf32, #tpu.memory_space<vmem>>, %arg2: memref<192x128xf32, #tpu.memory_space<vmem>>, %arg3: memref<1x128xf32, #tpu.memory_space<vmem>>, %arg4: memref<128x8xf32, #tpu.memory_space<vmem>>, %arg5: memref<8x4xf32, #tpu.memory_space<vmem>>, %arg6: memref<1x4xf32, #tpu.memory_space<vmem>>, %arg7: memref<4x128xf32, #tpu.memory_space<vmem>>, %arg8: memref<1x128xf32, #tpu.memory_space<vmem>>, %arg9: memref<128x64xf32, #tpu.memory_space<vmem>>, %arg10: memref<1x64xf32, #tpu.memory_space<vmem>>, %arg11: memref<64x128xf32, #tpu.memory_space<vmem>>, %arg12: memref<1x128xf32, #tpu.memory_space<vmem>>, %arg13: memref<2x16x128xf32, #tpu.memory_space<vmem>>, %arg14: memref<2x16x192xf32, #tpu.memory_space<vmem>>) attributes {dimension_semantics = [#tpu.dimension_semantics<parallel>], iteration_bounds = array<i64: 1>, scalar_prefetch = 0 : i64, scratch_operands = 1 : i64, tpu.core_type = #tpu.core_type<tc>, window_params = [{transform_indices = @transform_0, window_bounds = array<i64: 2, 16, 64>}, {pipeline_mode = #tpu.pipeline_mode<synchronous>, transform_indices = @transform_1, window_bounds = array<i64: 192, 128>}, {pipeline_mode = #tpu.pipeline_mode<synchronous>, transform_indices = @transform_2, window_bounds = array<i64: 1, 128>}, {pipeline_mode = #tpu.pipeline_mode<synchronous>, transform_indices = @transform_3, window_bounds = array<i64: 128, 8>}, {pipeline_mode = #tpu.pipeline_mode<synchronous>, transform_indices = @transform_4, window_bounds = array<i64: 8, 4>}, {pipeline_mode = #tpu.pipeline_mode<synchronous>, transform_indices = @transform_5, window_bounds = array<i64: 1, 4>}, {pipeline_mode = #tpu.pipeline_mode<synchronous>, transform_indices = @transform_6, window_bounds = array<i64: 4, 128>}, {pipeline_mode = #tpu.pipeline_mode<synchronous>, transform_indices = @transform_7, window_bounds = array<i64: 1, 128>}, {pipeline_mode = #tpu.pipeline_mode<synchronous>, transform_indices = @transform_8, window_bounds = array<i64: 128, 64>}, {pipeline_mode = #tpu.pipeline_mode<synchronous>, transform_indices = @transform_9, window_bounds = array<i64: 1, 64>}, {pipeline_mode = #tpu.pipeline_mode<synchronous>, transform_indices = @transform_10, window_bounds = array<i64: 64, 128>}, {pipeline_mode = #tpu.pipeline_mode<synchronous>, transform_indices = @transform_11, window_bounds = array<i64: 1, 128>}, {transform_indices = @transform_12, window_bounds = array<i64: 2, 16, 128>}]} {
    %c0 = arith.constant 0 : index
    %c0_0 = arith.constant 0 : index
    %c0_1 = arith.constant 0 : index
    %0 = vector.load %arg1[%c0, %c0_0, %c0_1] : memref<2x16x64xf32, #tpu.memory_space<vmem>>, vector<2x16x64xf32>
    %cst = arith.constant 0.000000e+00 : f32
    %1 = vector.broadcast %cst : f32 to vector<2x1x64xf32>
    %c0_2 = arith.constant 0 : index
    %c0_3 = arith.constant 0 : index
    %c64 = arith.constant 64 : index
    %2 = vector.load %arg14[%c0_2, %c0_3, %c64] : memref<2x16x192xf32, #tpu.memory_space<vmem>>, vector<2x16x64xf32>
    tpu.vector_store %arg14[%c0_2, %c0_3, %c64], %0 {strides = array<i32>} : memref<2x16x192xf32, #tpu.memory_space<vmem>>, vector<2x16x64xf32>,
    %3 = vector.extract_strided_slice %0 {offsets = [0, 0, 0], sizes = [2, 15, 64], strides = [1, 1, 1]} : vector<2x16x64xf32> to vector<2x15x64xf32>
    %c0_4 = arith.constant 0 : index
    %c1 = arith.constant 1 : index
    %c0_5 = arith.constant 0 : index
    %4 = vector.load %arg14[%c0_4, %c1, %c0_5] : memref<2x16x192xf32, #tpu.memory_space<vmem>>, vector<2x15x64xf32>
    tpu.vector_store %arg14[%c0_4, %c1, %c0_5], %3 {strides = array<i32>} : memref<2x16x192xf32, #tpu.memory_space<vmem>>, vector<2x15x64xf32>,
    %c0_6 = arith.constant 0 : index
    %c0_7 = arith.constant 0 : index
    %c0_8 = arith.constant 0 : index
    %5 = vector.load %arg14[%c0_6, %c0_7, %c0_8] : memref<2x16x192xf32, #tpu.memory_space<vmem>>, vector<2x1x64xf32>
    tpu.vector_store %arg14[%c0_6, %c0_7, %c0_8], %1 {strides = array<i32>} : memref<2x16x192xf32, #tpu.memory_space<vmem>>, vector<2x1x64xf32>,
    %6 = vector.extract_strided_slice %0 {offsets = [0, 1, 0], sizes = [2, 15, 64], strides = [1, 1, 1]} : vector<2x16x64xf32> to vector<2x15x64xf32>
    %c0_9 = arith.constant 0 : index
    %c0_10 = arith.constant 0 : index
    %c128 = arith.constant 128 : index
    %7 = vector.load %arg14[%c0_9, %c0_10, %c128] : memref<2x16x192xf32, #tpu.memory_space<vmem>>, vector<2x15x64xf32>
    tpu.vector_store %arg14[%c0_9, %c0_10, %c128], %6 {strides = array<i32>} : memref<2x16x192xf32, #tpu.memory_space<vmem>>, vector<2x15x64xf32>,
    %c0_11 = arith.constant 0 : index
    %c15 = arith.constant 15 : index
    %c128_12 = arith.constant 128 : index
    %8 = vector.load %arg14[%c0_11, %c15, %c128_12] : memref<2x16x192xf32, #tpu.memory_space<vmem>>, vector<2x1x64xf32>
    tpu.vector_store %arg14[%c0_11, %c15, %c128_12], %1 {strides = array<i32>} : memref<2x16x192xf32, #tpu.memory_space<vmem>>, vector<2x1x64xf32>,
    %c0_13 = arith.constant 0 : index
    %c0_14 = arith.constant 0 : index
    %c0_15 = arith.constant 0 : index
    %9 = vector.load %arg14[%c0_13, %c0_14, %c0_15] : memref<2x16x192xf32, #tpu.memory_space<vmem>>, vector<2x16x192xf32>
    %10 = vector.shape_cast %9 : vector<2x16x192xf32> to vector<32x192xf32>
    %c0_16 = arith.constant 0 : index
    %c0_17 = arith.constant 0 : index
    %11 = vector.load %arg2[%c0_16, %c0_17] : memref<192x128xf32, #tpu.memory_space<vmem>>, vector<192x128xf32>
    %cst_18 = arith.constant dense<0.000000e+00> : vector<32x128xf32>
    %12 = tpu.matmul %10, %11, %cst_18 {dimension_numbers = #tpu.dot_dimension_numbers<[1], [0], [0], [1], [0, 0, 1, 1], [], []>} : vector<32x192xf32>, vector<192x128xf32>, vector<32x128xf32> -> vector<32x128xf32>
    %c0_19 = arith.constant 0 : index
    %c0_20 = arith.constant 0 : index
    %13 = vector.load %arg3[%c0_19, %c0_20] : memref<1x128xf32, #tpu.memory_space<vmem>>, vector<1x128xf32>
    %14 = vector.broadcast %13 : vector<1x128xf32> to vector<32x128xf32>
    %15 = arith.addf %12, %14 : vector<32x128xf32>
    %cst_21 = arith.constant 0.000000e+00 : f32
    %16 = vector.broadcast %cst_21 : f32 to vector<32x128xf32>
    %17 = arith.maximumf %15, %16 : vector<32x128xf32>
    %18 = vector.shape_cast %17 : vector<32x128xf32> to vector<2x16x128xf32>
    %c0_22 = arith.constant 0 : index
    %c0_23 = arith.constant 0 : index
    %19 = vector.load %arg4[%c0_22, %c0_23] : memref<128x8xf32, #tpu.memory_space<vmem>>, vector<128x8xf32>
    %cst_24 = arith.constant dense<0.000000e+00> : vector<32x8xf32>
    %20 = tpu.matmul %17, %19, %cst_24 {dimension_numbers = #tpu.dot_dimension_numbers<[1], [0], [0], [1], [0, 0, 1, 1], [], []>} : vector<32x128xf32>, vector<128x8xf32>, vector<32x8xf32> -> vector<32x8xf32>
    %cst_25 = arith.constant dense<0.000000e+00> : vector<2x128xf32>
    %21 = vector.multi_reduction <add>, %18, %cst_25 [1] : vector<2x16x128xf32> to vector<2x128xf32>
    %cst_26 = arith.constant 6.250000e-02 : f32
    %22 = vector.broadcast %cst_26 : f32 to vector<2x128xf32>
    %23 = arith.mulf %21, %22 : vector<2x128xf32>
    %c0_27 = arith.constant 0 : index
    %c0_28 = arith.constant 0 : index
    %24 = vector.load %arg5[%c0_27, %c0_28] : memref<8x4xf32, #tpu.memory_space<vmem>>, vector<8x4xf32>
    %cst_29 = arith.constant dense<0.000000e+00> : vector<32x4xf32>
    %25 = tpu.matmul %20, %24, %cst_29 {dimension_numbers = #tpu.dot_dimension_numbers<[1], [0], [0], [1], [0, 0, 1, 1], [], []>} : vector<32x8xf32>, vector<8x4xf32>, vector<32x4xf32> -> vector<32x4xf32>
    %c0_30 = arith.constant 0 : index
    %c0_31 = arith.constant 0 : index
    %26 = vector.load %arg6[%c0_30, %c0_31] : memref<1x4xf32, #tpu.memory_space<vmem>>, vector<1x4xf32>
    %27 = vector.broadcast %26 : vector<1x4xf32> to vector<32x4xf32>
    %28 = arith.addf %25, %27 : vector<32x4xf32>
    %29 = arith.negf %28 : vector<32x4xf32>
    %30 = math.exp %29 : vector<32x4xf32>
    %cst_32 = arith.constant 1.000000e+00 : f32
    %31 = vector.broadcast %cst_32 : f32 to vector<32x4xf32>
    %32 = arith.addf %31, %30 : vector<32x4xf32>
    %33 = arith.divf %31, %32 : vector<32x4xf32>
    %34 = arith.mulf %28, %33 : vector<32x4xf32>
    %c0_33 = arith.constant 0 : index
    %c0_34 = arith.constant 0 : index
    %35 = vector.load %arg7[%c0_33, %c0_34] : memref<4x128xf32, #tpu.memory_space<vmem>>, vector<4x128xf32>
    %cst_35 = arith.constant dense<0.000000e+00> : vector<32x128xf32>
    %36 = tpu.matmul %34, %35, %cst_35 {dimension_numbers = #tpu.dot_dimension_numbers<[1], [0], [0], [1], [0, 0, 1, 1], [], []>} : vector<32x4xf32>, vector<4x128xf32>, vector<32x128xf32> -> vector<32x128xf32>
    %c0_36 = arith.constant 0 : index
    %c0_37 = arith.constant 0 : index
    %37 = vector.load %arg8[%c0_36, %c0_37] : memref<1x128xf32, #tpu.memory_space<vmem>>, vector<1x128xf32>
    %38 = vector.broadcast %37 : vector<1x128xf32> to vector<32x128xf32>
    %39 = arith.addf %36, %38 : vector<32x128xf32>
    %40 = arith.negf %39 : vector<32x128xf32>
    %41 = math.exp %40 : vector<32x128xf32>
    %cst_38 = arith.constant 1.000000e+00 : f32
    %42 = vector.broadcast %cst_38 : f32 to vector<32x128xf32>
    %43 = arith.addf %42, %41 : vector<32x128xf32>
    %44 = arith.divf %42, %43 : vector<32x128xf32>
    %c0_39 = arith.constant 0 : index
    %c0_40 = arith.constant 0 : index
    %45 = vector.load %arg9[%c0_39, %c0_40] : memref<128x64xf32, #tpu.memory_space<vmem>>, vector<128x64xf32>
    %cst_41 = arith.constant dense<0.000000e+00> : vector<2x64xf32>
    %46 = tpu.matmul %23, %45, %cst_41 {dimension_numbers = #tpu.dot_dimension_numbers<[1], [0], [0], [1], [0, 0, 1, 1], [], []>} : vector<2x128xf32>, vector<128x64xf32>, vector<2x64xf32> -> vector<2x64xf32>
    %c0_42 = arith.constant 0 : index
    %c0_43 = arith.constant 0 : index
    %47 = vector.load %arg10[%c0_42, %c0_43] : memref<1x64xf32, #tpu.memory_space<vmem>>, vector<1x64xf32>
    %48 = vector.broadcast %47 : vector<1x64xf32> to vector<2x64xf32>
    %49 = arith.addf %46, %48 : vector<2x64xf32>
    %50 = arith.negf %49 : vector<2x64xf32>
    %51 = math.exp %50 : vector<2x64xf32>
    %cst_44 = arith.constant 1.000000e+00 : f32
    %52 = vector.broadcast %cst_44 : f32 to vector<2x64xf32>
    %53 = arith.addf %52, %51 : vector<2x64xf32>
    %54 = arith.divf %52, %53 : vector<2x64xf32>
    %55 = arith.mulf %49, %54 : vector<2x64xf32>
    %c0_45 = arith.constant 0 : index
    %c0_46 = arith.constant 0 : index
    %56 = vector.load %arg11[%c0_45, %c0_46] : memref<64x128xf32, #tpu.memory_space<vmem>>, vector<64x128xf32>
    %cst_47 = arith.constant dense<0.000000e+00> : vector<2x128xf32>
    %57 = tpu.matmul %55, %56, %cst_47 {dimension_numbers = #tpu.dot_dimension_numbers<[1], [0], [0], [1], [0, 0, 1, 1], [], []>} : vector<2x64xf32>, vector<64x128xf32>, vector<2x128xf32> -> vector<2x128xf32>
    %c0_48 = arith.constant 0 : index
    %c0_49 = arith.constant 0 : index
    %58 = vector.load %arg12[%c0_48, %c0_49] : memref<1x128xf32, #tpu.memory_space<vmem>>, vector<1x128xf32>
    %59 = vector.broadcast %58 : vector<1x128xf32> to vector<2x128xf32>
    %60 = arith.addf %57, %59 : vector<2x128xf32>
    %61 = arith.negf %60 : vector<2x128xf32>
    %62 = math.exp %61 : vector<2x128xf32>
    %cst_50 = arith.constant 1.000000e+00 : f32
    %63 = vector.broadcast %cst_50 : f32 to vector<2x128xf32>
    %64 = arith.addf %63, %62 : vector<2x128xf32>
    %65 = arith.divf %63, %64 : vector<2x128xf32>
    %66 = vector.shape_cast %44 : vector<32x128xf32> to vector<2x16x128xf32>
    %67 = arith.mulf %18, %66 : vector<2x16x128xf32>
    %68 = vector.shape_cast %65 : vector<2x128xf32> to vector<2x1x128xf32>
    %69 = vector.broadcast %68 : vector<2x1x128xf32> to vector<2x16x128xf32>
    %70 = arith.mulf %67, %69 : vector<2x16x128xf32>
    %c0_51 = arith.constant 0 : index
    %c0_52 = arith.constant 0 : index
    %c0_53 = arith.constant 0 : index
    %71 = vector.load %arg13[%c0_51, %c0_52, %c0_53] : memref<2x16x128xf32, #tpu.memory_space<vmem>>, vector<2x16x128xf32>
    tpu.vector_store %arg13[%c0_51, %c0_52, %c0_53], %70 {strides = array<i32>} : memref<2x16x128xf32, #tpu.memory_space<vmem>>, vector<2x16x128xf32>,
    return
  }
  func.func @transform_0(%arg0: i32) -> (i32, i32, i32) {
    %c0_i32 = arith.constant 0 : i32
    %c0_i32_0 = arith.constant 0 : i32
    %c0_i32_1 = arith.constant 0 : i32
    return %arg0, %c0_i32, %c0_i32_0 : i32, i32, i32
  }
  func.func @transform_1(%arg0: i32) -> (i32, i32) {
    %c0_i32 = arith.constant 0 : i32
    %c0_i32_0 = arith.constant 0 : i32
    %c0_i32_1 = arith.constant 0 : i32
    return %c0_i32, %c0_i32_0 : i32, i32
  }
  func.func @transform_2(%arg0: i32) -> (i32, i32) {
    %c0_i32 = arith.constant 0 : i32
    %c0_i32_0 = arith.constant 0 : i32
    %c0_i32_1 = arith.constant 0 : i32
    return %c0_i32, %c0_i32_0 : i32, i32
  }
  func.func @transform_3(%arg0: i32) -> (i32, i32) {
    %c0_i32 = arith.constant 0 : i32
    %c0_i32_0 = arith.constant 0 : i32
    %c0_i32_1 = arith.constant 0 : i32
    return %c0_i32, %c0_i32_0 : i32, i32
  }
  func.func @transform_4(%arg0: i32) -> (i32, i32) {
    %c0_i32 = arith.constant 0 : i32
    %c0_i32_0 = arith.constant 0 : i32
    %c0_i32_1 = arith.constant 0 : i32
    return %c0_i32, %c0_i32_0 : i32, i32
  }
  func.func @transform_5(%arg0: i32) -> (i32, i32) {
    %c0_i32 = arith.constant 0 : i32
    %c0_i32_0 = arith.constant 0 : i32
    %c0_i32_1 = arith.constant 0 : i32
    return %c0_i32, %c0_i32_0 : i32, i32
  }
  func.func @transform_6(%arg0: i32) -> (i32, i32) {
    %c0_i32 = arith.constant 0 : i32
    %c0_i32_0 = arith.constant 0 : i32
    %c0_i32_1 = arith.constant 0 : i32
    return %c0_i32, %c0_i32_0 : i32, i32
  }
  func.func @transform_7(%arg0: i32) -> (i32, i32) {
    %c0_i32 = arith.constant 0 : i32
    %c0_i32_0 = arith.constant 0 : i32
    %c0_i32_1 = arith.constant 0 : i32
    return %c0_i32, %c0_i32_0 : i32, i32
  }
  func.func @transform_8(%arg0: i32) -> (i32, i32) {
    %c0_i32 = arith.constant 0 : i32
    %c0_i32_0 = arith.constant 0 : i32
    %c0_i32_1 = arith.constant 0 : i32
    return %c0_i32, %c0_i32_0 : i32, i32
  }
  func.func @transform_9(%arg0: i32) -> (i32, i32) {
    %c0_i32 = arith.constant 0 : i32
    %c0_i32_0 = arith.constant 0 : i32
    %c0_i32_1 = arith.constant 0 : i32
    return %c0_i32, %c0_i32_0 : i32, i32
  }
  func.func @transform_10(%arg0: i32) -> (i32, i32) {
    %c0_i32 = arith.constant 0 : i32
    %c0_i32_0 = arith.constant 0 : i32
    %c0_i32_1 = arith.constant 0 : i32
    return %c0_i32, %c0_i32_0 : i32, i32
  }
  func.func @transform_11(%arg0: i32) -> (i32, i32) {
    %c0_i32 = arith.constant 0 : i32
    %c0_i32_0 = arith.constant 0 : i32
    %c0_i32_1 = arith.constant 0 : i32
    return %c0_i32, %c0_i32_0 : i32, i32
  }
  func.func @transform_12(%arg0: i32) -> (i32, i32, i32) {
    %c0_i32 = arith.constant 0 : i32
    %c0_i32_0 = arith.constant 0 : i32
    %c0_i32_1 = arith.constant 0 : i32
    return %arg0, %c0_i32, %c0_i32_0 : i32, i32, i32
  }
}

module attributes {stable_mosaic.version = 11 : i64} {
  func.func @_coord_att_conv_kernel(%arg0: i32, %arg1: memref<2x16x64xf32, #tpu.memory_space<vmem>>, %arg2: memref<192x128xf32, #tpu.memory_space<vmem>>, %arg3: memref<1x128xf32, #tpu.memory_space<vmem>>, %arg4: memref<128x8xf32, #tpu.memory_space<vmem>>, %arg5: memref<8x4xf32, #tpu.memory_space<vmem>>, %arg6: memref<1x4xf32, #tpu.memory_space<vmem>>, %arg7: memref<4x128xf32, #tpu.memory_space<vmem>>, %arg8: memref<1x128xf32, #tpu.memory_space<vmem>>, %arg9: memref<128x64xf32, #tpu.memory_space<vmem>>, %arg10: memref<1x64xf32, #tpu.memory_space<vmem>>, %arg11: memref<64x128xf32, #tpu.memory_space<vmem>>, %arg12: memref<1x128xf32, #tpu.memory_space<vmem>>, %arg13: memref<2x16x128xf32, #tpu.memory_space<vmem>>, %arg14: memref<2x16x192xf32, #tpu.memory_space<vmem>>) attributes {dimension_semantics = [#tpu.dimension_semantics<parallel>], iteration_bounds = array<i64: 1>, scalar_prefetch = 0 : i64, scratch_operands = 1 : i64, tpu.core_type = #tpu.core_type<tc>, window_params = [{transform_indices = @transform_0, window_bounds = array<i64: 2, 16, 64>}, {pipeline_mode = #tpu.pipeline_mode<synchronous>, transform_indices = @transform_1, window_bounds = array<i64: 192, 128>}, {pipeline_mode = #tpu.pipeline_mode<synchronous>, transform_indices = @transform_2, window_bounds = array<i64: 1, 128>}, {pipeline_mode = #tpu.pipeline_mode<synchronous>, transform_indices = @transform_3, window_bounds = array<i64: 128, 8>}, {pipeline_mode = #tpu.pipeline_mode<synchronous>, transform_indices = @transform_4, window_bounds = array<i64: 8, 4>}, {pipeline_mode = #tpu.pipeline_mode<synchronous>, transform_indices = @transform_5, window_bounds = array<i64: 1, 4>}, {pipeline_mode = #tpu.pipeline_mode<synchronous>, transform_indices = @transform_6, window_bounds = array<i64: 4, 128>}, {pipeline_mode = #tpu.pipeline_mode<synchronous>, transform_indices = @transform_7, window_bounds = array<i64: 1, 128>}, {pipeline_mode = #tpu.pipeline_mode<synchronous>, transform_indices = @transform_8, window_bounds = array<i64: 128, 64>}, {pipeline_mode = #tpu.pipeline_mode<synchronous>, transform_indices = @transform_9, window_bounds = array<i64: 1, 64>}, {pipeline_mode = #tpu.pipeline_mode<synchronous>, transform_indices = @transform_10, window_bounds = array<i64: 64, 128>}, {pipeline_mode = #tpu.pipeline_mode<synchronous>, transform_indices = @transform_11, window_bounds = array<i64: 1, 128>}, {transform_indices = @transform_12, window_bounds = array<i64: 2, 16, 128>}]} {
    %c0 = arith.constant 0 : index
    %c0_0 = arith.constant 0 : index
    %c0_1 = arith.constant 0 : index
    %0 = vector.load %arg1[%c0, %c0_0, %c0_1] : memref<2x16x64xf32, #tpu.memory_space<vmem>>, vector<2x16x64xf32>
    %cst = arith.constant 0.000000e+00 : f32
    %1 = vector.broadcast %cst : f32 to vector<2x1x64xf32>
    %c0_2 = arith.constant 0 : index
    %c0_3 = arith.constant 0 : index
    %c64 = arith.constant 64 : index
    %2 = vector.load %arg14[%c0_2, %c0_3, %c64] : memref<2x16x192xf32, #tpu.memory_space<vmem>>, vector<2x16x64xf32>
    tpu.vector_store %arg14[%c0_2, %c0_3, %c64], %0 {strides = array<i32>} : memref<2x16x192xf32, #tpu.memory_space<vmem>>, vector<2x16x64xf32>,
    %3 = vector.extract_strided_slice %0 {offsets = [0, 0, 0], sizes = [2, 15, 64], strides = [1, 1, 1]} : vector<2x16x64xf32> to vector<2x15x64xf32>
    %c0_4 = arith.constant 0 : index
    %c1 = arith.constant 1 : index
    %c0_5 = arith.constant 0 : index
    %4 = vector.load %arg14[%c0_4, %c1, %c0_5] : memref<2x16x192xf32, #tpu.memory_space<vmem>>, vector<2x15x64xf32>
    tpu.vector_store %arg14[%c0_4, %c1, %c0_5], %3 {strides = array<i32>} : memref<2x16x192xf32, #tpu.memory_space<vmem>>, vector<2x15x64xf32>,
    %c0_6 = arith.constant 0 : index
    %c0_7 = arith.constant 0 : index
    %c0_8 = arith.constant 0 : index
    %5 = vector.load %arg14[%c0_6, %c0_7, %c0_8] : memref<2x16x192xf32, #tpu.memory_space<vmem>>, vector<2x1x64xf32>
    tpu.vector_store %arg14[%c0_6, %c0_7, %c0_8], %1 {strides = array<i32>} : memref<2x16x192xf32, #tpu.memory_space<vmem>>, vector<2x1x64xf32>,
    %6 = vector.extract_strided_slice %0 {offsets = [0, 1, 0], sizes = [2, 15, 64], strides = [1, 1, 1]} : vector<2x16x64xf32> to vector<2x15x64xf32>
    %c0_9 = arith.constant 0 : index
    %c0_10 = arith.constant 0 : index
    %c128 = arith.constant 128 : index
    %7 = vector.load %arg14[%c0_9, %c0_10, %c128] : memref<2x16x192xf32, #tpu.memory_space<vmem>>, vector<2x15x64xf32>
    tpu.vector_store %arg14[%c0_9, %c0_10, %c128], %6 {strides = array<i32>} : memref<2x16x192xf32, #tpu.memory_space<vmem>>, vector<2x15x64xf32>,
    %c0_11 = arith.constant 0 : index
    %c15 = arith.constant 15 : index
    %c128_12 = arith.constant 128 : index
    %8 = vector.load %arg14[%c0_11, %c15, %c128_12] : memref<2x16x192xf32, #tpu.memory_space<vmem>>, vector<2x1x64xf32>
    tpu.vector_store %arg14[%c0_11, %c15, %c128_12], %1 {strides = array<i32>} : memref<2x16x192xf32, #tpu.memory_space<vmem>>, vector<2x1x64xf32>,
    %c0_13 = arith.constant 0 : index
    %c0_14 = arith.constant 0 : index
    %c0_15 = arith.constant 0 : index
    %9 = vector.load %arg14[%c0_13, %c0_14, %c0_15] : memref<2x16x192xf32, #tpu.memory_space<vmem>>, vector<2x16x192xf32>
    %10 = vector.shape_cast %9 : vector<2x16x192xf32> to vector<32x192xf32>
    %c0_16 = arith.constant 0 : index
    %c0_17 = arith.constant 0 : index
    %11 = vector.load %arg2[%c0_16, %c0_17] : memref<192x128xf32, #tpu.memory_space<vmem>>, vector<192x128xf32>
    %cst_18 = arith.constant dense<0.000000e+00> : vector<32x128xf32>
    %12 = tpu.matmul %10, %11, %cst_18 {dimension_numbers = #tpu.dot_dimension_numbers<[1], [0], [0], [1], [0, 0, 1, 1], [], []>} : vector<32x192xf32>, vector<192x128xf32>, vector<32x128xf32> -> vector<32x128xf32>
    %c0_19 = arith.constant 0 : index
    %c0_20 = arith.constant 0 : index
    %13 = vector.load %arg3[%c0_19, %c0_20] : memref<1x128xf32, #tpu.memory_space<vmem>>, vector<1x128xf32>
    %14 = vector.broadcast %13 : vector<1x128xf32> to vector<32x128xf32>
    %15 = arith.addf %12, %14 : vector<32x128xf32>
    %cst_21 = arith.constant 0.000000e+00 : f32
    %16 = vector.broadcast %cst_21 : f32 to vector<32x128xf32>
    %17 = arith.maximumf %15, %16 : vector<32x128xf32>
    %18 = vector.shape_cast %17 : vector<32x128xf32> to vector<2x16x128xf32>
    %c0_22 = arith.constant 0 : index
    %c0_23 = arith.constant 0 : index
    %19 = vector.load %arg4[%c0_22, %c0_23] : memref<128x8xf32, #tpu.memory_space<vmem>>, vector<128x8xf32>
    %cst_24 = arith.constant dense<0.000000e+00> : vector<32x8xf32>
    %20 = tpu.matmul %17, %19, %cst_24 {dimension_numbers = #tpu.dot_dimension_numbers<[1], [0], [0], [1], [0, 0, 1, 1], [], []>} : vector<32x128xf32>, vector<128x8xf32>, vector<32x8xf32> -> vector<32x8xf32>
    %cst_25 = arith.constant dense<0.000000e+00> : vector<2x128xf32>
    %21 = vector.multi_reduction <add>, %18, %cst_25 [1] : vector<2x16x128xf32> to vector<2x128xf32>
    %cst_26 = arith.constant 6.250000e-02 : f32
    %22 = vector.broadcast %cst_26 : f32 to vector<2x128xf32>
    %23 = arith.mulf %21, %22 : vector<2x128xf32>
    %c0_27 = arith.constant 0 : index
    %c0_28 = arith.constant 0 : index
    %24 = vector.load %arg5[%c0_27, %c0_28] : memref<8x4xf32, #tpu.memory_space<vmem>>, vector<8x4xf32>
    %cst_29 = arith.constant dense<0.000000e+00> : vector<32x4xf32>
    %25 = tpu.matmul %20, %24, %cst_29 {dimension_numbers = #tpu.dot_dimension_numbers<[1], [0], [0], [1], [0, 0, 1, 1], [], []>} : vector<32x8xf32>, vector<8x4xf32>, vector<32x4xf32> -> vector<32x4xf32>
    %c0_30 = arith.constant 0 : index
    %c0_31 = arith.constant 0 : index
    %26 = vector.load %arg6[%c0_30, %c0_31] : memref<1x4xf32, #tpu.memory_space<vmem>>, vector<1x4xf32>
    %27 = vector.broadcast %26 : vector<1x4xf32> to vector<32x4xf32>
    %28 = arith.addf %25, %27 : vector<32x4xf32>
    %29 = arith.negf %28 : vector<32x4xf32>
    %30 = math.exp %29 : vector<32x4xf32>
    %cst_32 = arith.constant 1.000000e+00 : f32
    %31 = vector.broadcast %cst_32 : f32 to vector<32x4xf32>
    %32 = arith.addf %31, %30 : vector<32x4xf32>
    %33 = arith.divf %31, %32 : vector<32x4xf32>
    %34 = arith.mulf %28, %33 : vector<32x4xf32>
    %c0_33 = arith.constant 0 : index
    %c0_34 = arith.constant 0 : index
    %35 = vector.load %arg7[%c0_33, %c0_34] : memref<4x128xf32, #tpu.memory_space<vmem>>, vector<4x128xf32>
    %cst_35 = arith.constant dense<0.000000e+00> : vector<32x128xf32>
    %36 = tpu.matmul %34, %35, %cst_35 {dimension_numbers = #tpu.dot_dimension_numbers<[1], [0], [0], [1], [0, 0, 1, 1], [], []>} : vector<32x4xf32>, vector<4x128xf32>, vector<32x128xf32> -> vector<32x128xf32>
    %c0_36 = arith.constant 0 : index
    %c0_37 = arith.constant 0 : index
    %37 = vector.load %arg8[%c0_36, %c0_37] : memref<1x128xf32, #tpu.memory_space<vmem>>, vector<1x128xf32>
    %38 = vector.broadcast %37 : vector<1x128xf32> to vector<32x128xf32>
    %39 = arith.addf %36, %38 : vector<32x128xf32>
    %40 = arith.negf %39 : vector<32x128xf32>
    %41 = math.exp %40 : vector<32x128xf32>
    %cst_38 = arith.constant 1.000000e+00 : f32
    %42 = vector.broadcast %cst_38 : f32 to vector<32x128xf32>
    %43 = arith.addf %42, %41 : vector<32x128xf32>
    %44 = arith.divf %42, %43 : vector<32x128xf32>
    %c0_39 = arith.constant 0 : index
    %c0_40 = arith.constant 0 : index
    %45 = vector.load %arg9[%c0_39, %c0_40] : memref<128x64xf32, #tpu.memory_space<vmem>>, vector<128x64xf32>
    %cst_41 = arith.constant dense<0.000000e+00> : vector<2x64xf32>
    %46 = tpu.matmul %23, %45, %cst_41 {dimension_numbers = #tpu.dot_dimension_numbers<[1], [0], [0], [1], [0, 0, 1, 1], [], []>} : vector<2x128xf32>, vector<128x64xf32>, vector<2x64xf32> -> vector<2x64xf32>
    %c0_42 = arith.constant 0 : index
    %c0_43 = arith.constant 0 : index
    %47 = vector.load %arg10[%c0_42, %c0_43] : memref<1x64xf32, #tpu.memory_space<vmem>>, vector<1x64xf32>
    %48 = vector.broadcast %47 : vector<1x64xf32> to vector<2x64xf32>
    %49 = arith.addf %46, %48 : vector<2x64xf32>
    %50 = arith.negf %49 : vector<2x64xf32>
    %51 = math.exp %50 : vector<2x64xf32>
    %cst_44 = arith.constant 1.000000e+00 : f32
    %52 = vector.broadcast %cst_44 : f32 to vector<2x64xf32>
    %53 = arith.addf %52, %51 : vector<2x64xf32>
    %54 = arith.divf %52, %53 : vector<2x64xf32>
    %55 = arith.mulf %49, %54 : vector<2x64xf32>
    %c0_45 = arith.constant 0 : index
    %c0_46 = arith.constant 0 : index
    %56 = vector.load %arg11[%c0_45, %c0_46] : memref<64x128xf32, #tpu.memory_space<vmem>>, vector<64x128xf32>
    %cst_47 = arith.constant dense<0.000000e+00> : vector<2x128xf32>
    %57 = tpu.matmul %55, %56, %cst_47 {dimension_numbers = #tpu.dot_dimension_numbers<[1], [0], [0], [1], [0, 0, 1, 1], [], []>} : vector<2x64xf32>, vector<64x128xf32>, vector<2x128xf32> -> vector<2x128xf32>
    %c0_48 = arith.constant 0 : index
    %c0_49 = arith.constant 0 : index
    %58 = vector.load %arg12[%c0_48, %c0_49] : memref<1x128xf32, #tpu.memory_space<vmem>>, vector<1x128xf32>
    %59 = vector.broadcast %58 : vector<1x128xf32> to vector<2x128xf32>
    %60 = arith.addf %57, %59 : vector<2x128xf32>
    %61 = arith.negf %60 : vector<2x128xf32>
    %62 = math.exp %61 : vector<2x128xf32>
    %cst_50 = arith.constant 1.000000e+00 : f32
    %63 = vector.broadcast %cst_50 : f32 to vector<2x128xf32>
    %64 = arith.addf %63, %62 : vector<2x128xf32>
    %65 = arith.divf %63, %64 : vector<2x128xf32>
    %66 = vector.shape_cast %44 : vector<32x128xf32> to vector<2x16x128xf32>
    %67 = arith.mulf %18, %66 : vector<2x16x128xf32>
    %68 = vector.shape_cast %65 : vector<2x128xf32> to vector<2x1x128xf32>
    %69 = vector.broadcast %68 : vector<2x1x128xf32> to vector<2x16x128xf32>
    %70 = arith.mulf %67, %69 : vector<2x16x128xf32>
    %c0_51 = arith.constant 0 : index
    %c0_52 = arith.constant 0 : index
    %c0_53 = arith.constant 0 : index
    %71 = vector.load %arg13[%c0_51, %c0_52, %c0_53] : memref<2x16x128xf32, #tpu.memory_space<vmem>>, vector<2x16x128xf32>
    tpu.vector_store %arg13[%c0_51, %c0_52, %c0_53], %70 {strides = array<i32>} : memref<2x16x128xf32, #tpu.memory_space<vmem>>, vector<2x16x128xf32>,
    return
  }
  func.func @transform_0(%arg0: i32) -> (i32, i32, i32) {
    %c0_i32 = arith.constant 0 : i32
    %c0_i32_0 = arith.constant 0 : i32
    %c0_i32_1 = arith.constant 0 : i32
    return %arg0, %c0_i32, %c0_i32_0 : i32, i32, i32
  }
  func.func @transform_1(%arg0: i32) -> (i32, i32) {
    %c0_i32 = arith.constant 0 : i32
    %c0_i32_0 = arith.constant 0 : i32
    %c0_i32_1 = arith.constant 0 : i32
    return %c0_i32, %c0_i32_0 : i32, i32
  }
  func.func @transform_2(%arg0: i32) -> (i32, i32) {
    %c0_i32 = arith.constant 0 : i32
    %c0_i32_0 = arith.constant 0 : i32
    %c0_i32_1 = arith.constant 0 : i32
    return %c0_i32, %c0_i32_0 : i32, i32
  }
  func.func @transform_3(%arg0: i32) -> (i32, i32) {
    %c0_i32 = arith.constant 0 : i32
    %c0_i32_0 = arith.constant 0 : i32
    %c0_i32_1 = arith.constant 0 : i32
    return %c0_i32, %c0_i32_0 : i32, i32
  }
  func.func @transform_4(%arg0: i32) -> (i32, i32) {
    %c0_i32 = arith.constant 0 : i32
    %c0_i32_0 = arith.constant 0 : i32
    %c0_i32_1 = arith.constant 0 : i32
    return %c0_i32, %c0_i32_0 : i32, i32
  }
  func.func @transform_5(%arg0: i32) -> (i32, i32) {
    %c0_i32 = arith.constant 0 : i32
    %c0_i32_0 = arith.constant 0 : i32
    %c0_i32_1 = arith.constant 0 : i32
    return %c0_i32, %c0_i32_0 : i32, i32
  }
  func.func @transform_6(%arg0: i32) -> (i32, i32) {
    %c0_i32 = arith.constant 0 : i32
    %c0_i32_0 = arith.constant 0 : i32
    %c0_i32_1 = arith.constant 0 : i32
    return %c0_i32, %c0_i32_0 : i32, i32
  }
  func.func @transform_7(%arg0: i32) -> (i32, i32) {
    %c0_i32 = arith.constant 0 : i32
    %c0_i32_0 = arith.constant 0 : i32
    %c0_i32_1 = arith.constant 0 : i32
    return %c0_i32, %c0_i32_0 : i32, i32
  }
  func.func @transform_8(%arg0: i32) -> (i32, i32) {
    %c0_i32 = arith.constant 0 : i32
    %c0_i32_0 = arith.constant 0 : i32
    %c0_i32_1 = arith.constant 0 : i32
    return %c0_i32, %c0_i32_0 : i32, i32
  }
  func.func @transform_9(%arg0: i32) -> (i32, i32) {
    %c0_i32 = arith.constant 0 : i32
    %c0_i32_0 = arith.constant 0 : i32
    %c0_i32_1 = arith.constant 0 : i32
    return %c0_i32, %c0_i32_0 : i32, i32
  }
  func.func @transform_10(%arg0: i32) -> (i32, i32) {
    %c0_i32 = arith.constant 0 : i32
    %c0_i32_0 = arith.constant 0 : i32
    %c0_i32_1 = arith.constant 0 : i32
    return %c0_i32, %c0_i32_0 : i32, i32
  }
  func.func @transform_11(%arg0: i32) -> (i32, i32) {
    %c0_i32 = arith.constant 0 : i32
    %c0_i32_0 = arith.constant 0 : i32
    %c0_i32_1 = arith.constant 0 : i32
    return %c0_i32, %c0_i32_0 : i32, i32
  }
  func.func @transform_12(%arg0: i32) -> (i32, i32, i32) {
    %c0_i32 = arith.constant 0 : i32
    %c0_i32_0 = arith.constant 0 : i32
    %c0_i32_1 = arith.constant 0 : i32
    return %arg0, %c0_i32, %c0_i32_0 : i32, i32, i32
  }
}

</mosaic_0001>

<bundles_post_ra>
// kernel: tile.37
= control target key start
LH: loop header
LB: loop body
LE: loop exit
PB: predicated region body
PF: predicated region fallthrough
CT: control target
= control target key end

     0   :  { %vm6_vm0 = vcmask 1043458   ;;  %s11_s6 = smov 3  ;;  %s14_s7 = smov 12  ;;  %vm8_vm1 = vcmask 64512   ;;  %vm20_vm2 = vcmask 1048512   ;;  %vm32_vm3 = vcmask 982912   ;;  %s381_s0 = inlined_call_operand.vmem [shape: f32[4,16,8], index: 0, kind: input, shape index: {}]   ;;  %s382_s1 = inlined_call_operand.vmem [shape: f32[4,128], index: 1, kind: output, shape index: {}]  }
   0x1   :  { %v196_v0 = vld [vmem:[%s381_s0 + $0xf] ss:$16 sm:%s11_s6]   ;;  %s35_s12 = smov 3  ;;  %s38_s15 = smov 12  ;;  %vm44_vm4 = vcmask 917312   ;;  %vm56_vm5 = vcmask 851712  }
   0x2   :  { %v197_v1 = vld [vmem:[%s381_s0 + $0xf] ss:$16 sm:%s14_s7]   ;;  %v200_v3 = vld [vmem:[%s381_s0 + $0xd] ss:$16 sm:%s35_s12]   ;;  %s241_s16 = smov 120   ;;  %s23_s19 = smov 3 }
   0x3   :  { %v17_v2 = vsel %vm6_vm0, %v197_v1, %v196_v0  ;;  %v201_v4 = vld [vmem:[%s381_s0 + $0xd] ss:$16 sm:%s38_s15]   ;;  %s26_s20 = smov 12  ;;  %v198_v6 = vld [vmem:[%s381_s0 + $0xe] ss:$16 sm:%s23_s19]   ;;  %s47_s25 = smov 3 }
   0x4   :  { %18 = vrot.lane.b32.xlu0 %v17_v2, %s241_s16  ;;  %v41_v5 = vsel %vm6_vm0, %v201_v4, %v200_v3  ;;  %v199_v7 = vld [vmem:[%s381_s0 + $0xe] ss:$16 sm:%s26_s20]   ;;  %s242_s26 = smov 104   ;;  %s50_s29 = smov 12  ;;  %vm68_vm6 = vcmask 786112   ;;  %vm80_vm7 = vcmask 720512  }
   0x5   :  { %42 = vrot.lane.b32.xlu1 %v41_v5, %s242_s26  ;;  %v29_v8 = vsel %vm6_vm0, %v199_v7, %v198_v6  ;;  %v202_v9 = vld [vmem:[%s381_s0 + $0xc] ss:$16 sm:%s47_s25]   ;;  %s59_s3 = smov 3  ;;  %s62_s4 = smov 12  ;;  %vm92_vm8 = vcmask 654912   ;;  %vm104_vm9 = vcmask 589312  }
   0x6   :  { %v203_v10 = vld [vmem:[%s381_s0 + $0xc] ss:$16 sm:%s50_s29]   ;;  %s243_s5 = smov 112   ;;  %v204_v12 = vld [vmem:[%s381_s0 + $0xb] ss:$16 sm:%s59_s3]   ;;  %s71_s8 = smov 3 }
   0x7   :  { %v53_v11 = vsel %vm6_vm0, %v203_v10, %v202_v9  ;;  %v205_v13 = vld [vmem:[%s381_s0 + $0xb] ss:$16 sm:%s62_s4]   ;;  %v206_v14 = vld [vmem:[%s381_s0 + $0xa] ss:$16 sm:%s71_s8]   ;;  %s74_s13 = smov 12  ;;  %s244_s14 = smov 96  }
   0x8   :  { %30 = vrot.lane.b32.xlu0 %v29_v8, %s243_s5  ;;  %v65_v15 = vsel %vm6_vm0, %v205_v13, %v204_v12  ;;  %v207_v16 = vld [vmem:[%s381_s0 + $0xa] ss:$16 sm:%s74_s13]   ;;  %s83_s17 = smov 3  ;;  %s86_s18 = smov 12  ;;  %vm116_vm10 = vcmask 523712   ;;  %vm128_vm11 = vcmask 458112  }
   0x9   :  { %54 = vrot.lane.b32.xlu1 %v53_v11, %s244_s14  ;;  %v77_v17 = vsel %vm6_vm0, %v207_v16, %v206_v14  ;;  %v208_v18 = vld [vmem:[%s381_s0 + $0x9] ss:$16 sm:%s83_s17]   ;;  %s95_s23 = smov 3  ;;  %s245_s24 = smov 88   ;;  %vm140_vm12 = vcmask 392512   ;;  %vm152_vm13 = vcmask 326912  }
   0xa   :  { %v209_v19 = vld [vmem:[%s381_s0 + $0x9] ss:$16 sm:%s86_s18]   ;;  %v210_v20 = vld [vmem:[%s381_s0 + $0x8] ss:$16 sm:%s95_s23]   ;;  %s98_s27 = smov 12  ;;  %s107_s30 = smov 3 }
   0xb   :  { %v89_v21 = vsel %vm6_vm0, %v209_v19, %v208_v18  ;;  %v211_v22 = vld [vmem:[%s381_s0 + $0x8] ss:$16 sm:%s98_s27]   ;;  %s110_s2 = smov 12  ;;  %s246_s3 = smov 80   ;;  %v212_v23 = vld [vmem:[%s381_s0 + $0x7] ss:$16 sm:%s107_s30]  }
   0xc   :  { %66 = vrot.lane.b32.xlu0 %v65_v15, %s245_s24  ;;  %s119_s6 = smov 3  ;;  %v101_v24 = vsel %vm6_vm0, %v211_v22, %v210_v20  ;;  %v213_v25 = vld [vmem:[%s381_s0 + $0x7] ss:$16 sm:%s110_s2]   ;;  %s122_s11 = smov 12  ;;  %vm164_vm14 = vcmask 261312   ;;  %vm176_vm15 = vcmask 195712  }
   0xd   :  { %78 = vrot.lane.b32.xlu1 %v77_v17, %s246_s3  ;;  %v214_v26 = vld [vmem:[%s381_s0 + $0x6] ss:$16 sm:%s119_s6]   ;;  %s247_s12 = smov 72   ;;  %s131_s15 = smov 3  ;;  %v113_v28 = vsel %vm6_vm0, %v213_v25, %v212_v23 }
   0xe   :  { %v215_v27 = vld [vmem:[%s381_s0 + $0x6] ss:$16 sm:%s122_s11]   ;;  %s134_s16 = smov 12  ;;  %v216_v29 = vld [vmem:[%s381_s0 + $0x5] ss:$16 sm:%s131_s15]   ;;  %s143_s19 = smov 3 }
   0xf   :  { %s248_s20 = smov 64   ;;  %v217_v30 = vld [vmem:[%s381_s0 + $0x5] ss:$16 sm:%s134_s16]   ;;  %s146_s23 = smov 12  ;;  %v125_v31 = vsel %vm6_vm0, %v215_v27, %v214_v26  ;;  %v218_v32 = vld [vmem:[%s381_s0 + $0x4] ss:$16 sm:%s143_s19]  }
  0x10   :  { %90 = vrot.lane.b32.xlu0 %v89_v21, %s247_s12  ;;  %s155_s26 = smov 3  ;;  %s158_s27 = smov 12  ;;  %v219_v33 = vld [vmem:[%s381_s0 + $0x4] ss:$16 sm:%s146_s23]   ;;  %v137_v34 = vsel %vm6_vm0, %v217_v30, %v216_v29 }
  0x11   :  { %102 = vrot.lane.b32.xlu1 %v101_v24, %s248_s20  ;;  %s249_s28 = smov 56   ;;  %s167_s2 = smov 3  ;;  %v220_v35 = vld [vmem:[%s381_s0 + $0x3] ss:$16 sm:%s155_s26]   ;;  %v149_v37 = vsel %vm6_vm0, %v219_v33, %v218_v32 }
  0x12   :  { %s170_s5 = smov 12  ;;  %s250_s6 = smov 48   ;;  %v221_v36 = vld [vmem:[%s381_s0 + $0x3] ss:$16 sm:%s158_s27]   ;;  %v222_v38 = vld [vmem:[%s381_s0 + $0x2] ss:$16 sm:%s167_s2]  }
  0x13   :  { %s179_s9 = smov 3  ;;  %v223_v39 = vld [vmem:[%s381_s0 + $0x2] ss:$16 sm:%s170_s5]   ;;  %s182_s14 = smov 12  ;;  %v161_v41 = vsel %vm6_vm0, %v221_v36, %v220_v35 }
  0x14   :  { %114 = vrot.lane.b32.xlu0 %v113_v28, %s249_s28  ;;  %s2_s15 = smov 3  ;;  %s251_s16 = smov 40   ;;  %v224_v42 = vld [vmem:[%s381_s0 + $0x1] ss:$16 sm:%s179_s9]   ;;  %v173_v46 = vsel %vm6_vm0, %v223_v39, %v222_v38 }
  0x15   :  { %126 = vrot.lane.b32.xlu1 %v125_v31, %s250_s6  ;;  %v3_v40 = vld [vmem:[%s381_s0] ss:$16 sm:%s2_s15]   ;;  %s4_s19 = smov 12  ;;  %s252_s24 = smov 32  }
  0x16   :  { %v5_v43 = vld [vmem:[%s381_s0] ss:$16 sm:%s4_s19]   ;;  %v225_v44 = vld [vmem:[%s381_s0 + $0x1] ss:$16 sm:%s182_s14]   ;;  %s253_s0 = smov 24   ;;  %s254_s27 = smov 16  }
  0x17   :  { %v7_v45 = vsel %vm6_vm0, %v5_v43, %v3_v40  ;;  %v185_v47 = vsel %vm6_vm0, %v225_v44, %v224_v42  ;;  %s255_s28 = smov 8   ;;  %vm188_vm0 = vcmask 130112  }
  0x18   :  { %138 = vrot.lane.b32.xlu0 %v137_v34, %s251_s16  ;;  %9 = vst.msk [vmem:[#allocation0] sm:$0xf] %vm8_vm1, %v7_v45  }
  0x19   :  { %150 = vrot.lane.b32.xlu1 %v149_v37, %s252_s24 }
  0x1c   :  { %162 = vrot.lane.b32.xlu0 %v161_v41, %s253_s0 }
  0x1d   :  { %174 = vrot.lane.b32.xlu1 %v173_v46, %s254_s27 }
  0x20   :  { %186 = vrot.lane.b32.xlu0 %v185_v47, %s255_s28 }
  0x76   :  { %v19_v48 = vpop.permute.xlu0 %18  }
  0x77   :  { %21 = vst.msk [vmem:[#allocation0] sm:$0xf] %vm20_vm2, %v19_v48   ;;  %v43_v49 = vpop.permute.xlu1 %42  }
  0x7a   :  { %v31_v50 = vpop.permute.xlu0 %30  }
  0x7b   :  { %33 = vst.msk [vmem:[#allocation0] sm:$0xf] %vm32_vm3, %v31_v50   ;;  %v55_v51 = vpop.permute.xlu1 %54  }
  0x7c   :  { %45 = vst.msk [vmem:[#allocation0] sm:$0xf] %vm44_vm4, %v43_v49  }
  0x7d   :  { %57 = vst.msk [vmem:[#allocation0] sm:$0xf] %vm56_vm5, %v55_v51  }
  0x7e   :  { %v67_v52 = vpop.permute.xlu0 %66  }
  0x7f   :  { %69 = vst.msk [vmem:[#allocation0] sm:$0xf] %vm68_vm6, %v67_v52   ;;  %v79_v53 = vpop.permute.xlu1 %78  }
  0x80   :  { %81 = vst.msk [vmem:[#allocation0] sm:$0xf] %vm80_vm7, %v79_v53  }
  0x82   :  { %v91_v54 = vpop.permute.xlu0 %90  }
  0x83   :  { %93 = vst.msk [vmem:[#allocation0] sm:$0xf] %vm92_vm8, %v91_v54   ;;  %v103_v55 = vpop.permute.xlu1 %102  }
  0x84   :  { %105 = vst.msk [vmem:[#allocation0] sm:$0xf] %vm104_vm9, %v103_v55  }
  0x86   :  { %v115_v56 = vpop.permute.xlu0 %114  }
  0x87   :  { %117 = vst.msk [vmem:[#allocation0] sm:$0xf] %vm116_vm10, %v115_v56   ;;  %v127_v57 = vpop.permute.xlu1 %126  }
  0x88   :  { %129 = vst.msk [vmem:[#allocation0] sm:$0xf] %vm128_vm11, %v127_v57  }
  0x8a   :  { %v139_v58 = vpop.permute.xlu0 %138  }
  0x8b   :  { %141 = vst.msk [vmem:[#allocation0] sm:$0xf] %vm140_vm12, %v139_v58   ;;  %v151_v59 = vpop.permute.xlu1 %150  }
  0x8c   :  { %153 = vst.msk [vmem:[#allocation0] sm:$0xf] %vm152_vm13, %v151_v59  }
  0x8e   :  { %v163_v60 = vpop.permute.xlu0 %162  }
  0x8f   :  { %165 = vst.msk [vmem:[#allocation0] sm:$0xf] %vm164_vm14, %v163_v60   ;;  %v175_v61 = vpop.permute.xlu1 %174  }
  0x90   :  { %177 = vst.msk [vmem:[#allocation0] sm:$0xf] %vm176_vm15, %v175_v61  }
  0x92   :  { %v187_v62 = vpop.permute.xlu0 %186  }
  0x93   :  { %189 = vst.msk [vmem:[#allocation0] sm:$0xf] %vm188_vm0, %v187_v62  }
  0x9a   :  { %v193_v63 = vld [vmem:[#allocation0] sm:$0xf] }
  0x9b   :  { %195 = vst [vmem:[%s382_s1] sm:$0xf] %v193_v63 }

// kernel: tile.32
= control target key start
LH: loop header
LB: loop body
LE: loop exit
PB: predicated region body
PF: predicated region fallthrough
CT: control target
= control target key end

     0   :  { %s28_s0 = inlined_call_operand.vmem [shape: f32[8], index: 0, kind: input, shape index: {}]   ;;  %s29_s1 = inlined_call_operand.vmem [shape: f32[16,8], index: 1, kind: output, shape index: {}]  }
   0x1   :  { %v4_v0 = vld [vmem:[%s28_s0] ss:$0 sm:$0xff] }
   0x2   :  { %5 = vst [vmem:[%s29_s1] sm:$0xff] %v4_v0  ;;  %8 = vst [vmem:[%s29_s1 + $0x8] sm:$0xff] %v4_v0 }

// kernel: tile.33
= control target key start
LH: loop header
LB: loop body
LE: loop exit
PB: predicated region body
PF: predicated region fallthrough
CT: control target
= control target key end

     0   :  { %s131_s10 = smov 120   ;;  %s132_s11 = smov 104   ;;  %vm3_vm0 = vcmask 64512   ;;  %vm9_vm1 = vcmask 1048512   ;;  %vm15_vm2 = vcmask 982912   ;;  %vm21_vm3 = vcmask 917312   ;;  %s207_s0 = inlined_call_operand.vmem [shape: f32[16,8], index: 0, kind: input, shape index: {}]   ;;  %s208_s1 = inlined_call_operand.vmem [shape: f32[1,128], index: 1, kind: output, shape index: {}]  }
   0x1   :  { %v101_v0 = vld [vmem:[%s207_s0 + $0xf] sm:$0x1]   ;;  %v103_v1 = vld [vmem:[%s207_s0 + $0xd] sm:$0x1]   ;;  %v102_v2 = vld [vmem:[%s207_s0 + $0xe] sm:$0x1]  }
   0x2   :  { %7 = vrot.lane.b32.xlu0 %v101_v0, %s131_s10  ;;  %19 = vrot.lane.b32.xlu1 %v103_v1, %s132_s11  ;;  %v104_v3 = vld [vmem:[%s207_s0 + $0xc] sm:$0x1]   ;;  %s133_s16 = smov 112   ;;  %s134_s17 = smov 96   ;;  %v105_v4 = vld [vmem:[%s207_s0 + $0xb] sm:$0x1]  }
   0x3   :  { %v106_v5 = vld [vmem:[%s207_s0 + $0xa] sm:$0x1]   ;;  %v2_v6 = vld [vmem:[%s207_s0] sm:$0x1]   ;;  %s135_s24 = smov 88   ;;  %s136_s25 = smov 80  }
   0x4   :  { %4 = vst.msk [vmem:[#allocation0] sm:$0x1] %vm3_vm0, %v2_v6   ;;  %v107_v7 = vld [vmem:[%s207_s0 + $0x9] sm:$0x1]   ;;  %v108_v8 = vld [vmem:[%s207_s0 + $0x8] sm:$0x1]  }
   0x5   :  { %s137_s30 = smov 72   ;;  %s138_s2 = smov 64   ;;  %v109_v9 = vld [vmem:[%s207_s0 + $0x7] sm:$0x1]   ;;  %v110_v10 = vld [vmem:[%s207_s0 + $0x6] sm:$0x1]  }
   0x6   :  { %13 = vrot.lane.b32.xlu0 %v102_v2, %s133_s16  ;;  %25 = vrot.lane.b32.xlu1 %v104_v3, %s134_s17  ;;  %s139_s7 = smov 56   ;;  %s140_s8 = smov 48   ;;  %v111_v11 = vld [vmem:[%s207_s0 + $0x5] sm:$0x1]   ;;  %v112_v12 = vld [vmem:[%s207_s0 + $0x4] sm:$0x1]  }
   0x7   :  { %s141_s13 = smov 40   ;;  %s142_s14 = smov 32   ;;  %v113_v13 = vld [vmem:[%s207_s0 + $0x3] sm:$0x1]   ;;  %v114_v14 = vld [vmem:[%s207_s0 + $0x2] sm:$0x1]  }
   0x8   :  { %s143_s19 = smov 24   ;;  %s144_s20 = smov 16   ;;  %v115_v15 = vld [vmem:[%s207_s0 + $0x1] sm:$0x1]   ;;  %vm27_vm4 = vcmask 851712   ;;  %vm33_vm5 = vcmask 786112  }
   0x9   :  { %s145_s0 = smov 8   ;;  %vm39_vm6 = vcmask 720512   ;;  %vm45_vm7 = vcmask 654912   ;;  %vm51_vm8 = vcmask 589312   ;;  %vm57_vm9 = vcmask 523712  }
   0xa   :  { %31 = vrot.lane.b32.xlu0 %v105_v4, %s135_s24  ;;  %37 = vrot.lane.b32.xlu1 %v106_v5, %s136_s25  ;;  %vm63_vm10 = vcmask 458112   ;;  %vm69_vm11 = vcmask 392512   ;;  %vm75_vm12 = vcmask 326912   ;;  %vm81_vm13 = vcmask 261312  }
   0xb   :  { %vm87_vm14 = vcmask 195712   ;;  %vm93_vm15 = vcmask 130112  }
   0xe   :  { %43 = vrot.lane.b32.xlu0 %v107_v7, %s137_s30  ;;  %49 = vrot.lane.b32.xlu1 %v108_v8, %s138_s2 }
  0x12   :  { %55 = vrot.lane.b32.xlu0 %v109_v9, %s139_s7  ;;  %61 = vrot.lane.b32.xlu1 %v110_v10, %s140_s8 }
  0x16   :  { %67 = vrot.lane.b32.xlu0 %v111_v11, %s141_s13  ;;  %73 = vrot.lane.b32.xlu1 %v112_v12, %s142_s14 }
  0x1a   :  { %79 = vrot.lane.b32.xlu0 %v113_v13, %s143_s19  ;;  %85 = vrot.lane.b32.xlu1 %v114_v14, %s144_s20 }
  0x1e   :  { %91 = vrot.lane.b32.xlu0 %v115_v15, %s145_s0 }
  0x74   :  { %v8_v16 = vpop.permute.xlu0 %7   ;;  %v20_v17 = vpop.permute.xlu1 %19  }
  0x75   :  { %10 = vst.msk [vmem:[#allocation0] sm:$0x1] %vm9_vm1, %v8_v16  }
  0x78   :  { %v14_v18 = vpop.permute.xlu0 %13   ;;  %v26_v19 = vpop.permute.xlu1 %25  }
  0x79   :  { %16 = vst.msk [vmem:[#allocation0] sm:$0x1] %vm15_vm2, %v14_v18  }
  0x7a   :  { %22 = vst.msk [vmem:[#allocation0] sm:$0x1] %vm21_vm3, %v20_v17  }
  0x7b   :  { %28 = vst.msk [vmem:[#allocation0] sm:$0x1] %vm27_vm4, %v26_v19  }
  0x7c   :  { %v32_v20 = vpop.permute.xlu0 %31   ;;  %v38_v21 = vpop.permute.xlu1 %37  }
  0x7d   :  { %34 = vst.msk [vmem:[#allocation0] sm:$0x1] %vm33_vm5, %v32_v20  }
  0x7e   :  { %40 = vst.msk [vmem:[#allocation0] sm:$0x1] %vm39_vm6, %v38_v21  }
  0x80   :  { %v44_v22 = vpop.permute.xlu0 %43   ;;  %v50_v23 = vpop.permute.xlu1 %49  }
  0x81   :  { %46 = vst.msk [vmem:[#allocation0] sm:$0x1] %vm45_vm7, %v44_v22  }
  0x82   :  { %52 = vst.msk [vmem:[#allocation0] sm:$0x1] %vm51_vm8, %v50_v23  }
  0x84   :  { %v56_v24 = vpop.permute.xlu0 %55   ;;  %v62_v25 = vpop.permute.xlu1 %61  }
  0x85   :  { %58 = vst.msk [vmem:[#allocation0] sm:$0x1] %vm57_vm9, %v56_v24  }
  0x86   :  { %64 = vst.msk [vmem:[#allocation0] sm:$0x1] %vm63_vm10, %v62_v25  }
  0x88   :  { %v68_v26 = vpop.permute.xlu0 %67   ;;  %v74_v27 = vpop.permute.xlu1 %73  }
  0x89   :  { %70 = vst.msk [vmem:[#allocation0] sm:$0x1] %vm69_vm11, %v68_v26  }
  0x8a   :  { %76 = vst.msk [vmem:[#allocation0] sm:$0x1] %vm75_vm12, %v74_v27  }
  0x8c   :  { %v80_v28 = vpop.permute.xlu0 %79   ;;  %v86_v29 = vpop.permute.xlu1 %85  }
  0x8d   :  { %82 = vst.msk [vmem:[#allocation0] sm:$0x1] %vm81_vm13, %v80_v28  }
  0x8e   :  { %88 = vst.msk [vmem:[#allocation0] sm:$0x1] %vm87_vm14, %v86_v29  }
  0x90   :  { %v92_v30 = vpop.permute.xlu0 %91  }
  0x91   :  { %94 = vst.msk [vmem:[#allocation0] sm:$0x1] %vm93_vm15, %v92_v30  }
  0x98   :  { %v98_v31 = vld [vmem:[#allocation0] sm:$0x1] }
  0x99   :  { %100 = vst [vmem:[%s208_s1] sm:$0x1] %v98_v31 }

// kernel: tile.44
= control target key start
LH: loop header
LB: loop body
LE: loop exit
PB: predicated region body
PF: predicated region fallthrough
CT: control target
= control target key end

     0   :  { %s28_s0 = inlined_call_operand.vmem [shape: f32[4], index: 0, kind: input, shape index: {}]   ;;  %s29_s1 = inlined_call_operand.vmem [shape: f32[16,4], index: 1, kind: output, shape index: {}]  }
   0x1   :  { %v4_v0 = vld [vmem:[%s28_s0] ss:$0 sm:$0xff] }
   0x2   :  { %5 = vst [vmem:[%s29_s1] sm:$0xff] %v4_v0  ;;  %8 = vst [vmem:[%s29_s1 + $0x8] sm:$0xff] %v4_v0 }

// kernel: tile.45
= control target key start
LH: loop header
LB: loop body
LE: loop exit
PB: predicated region body
PF: predicated region fallthrough
CT: control target
= control target key end

     0   :  { %s131_s10 = smov 60   ;;  %s132_s11 = smov 52   ;;  %vm3_vm0 = vcmask 31744   ;;  %vm9_vm1 = vcmask 523744   ;;  %vm15_vm2 = vcmask 490944   ;;  %vm21_vm3 = vcmask 458144   ;;  %s207_s0 = inlined_call_operand.vmem [shape: f32[16,4], index: 0, kind: input, shape index: {}]   ;;  %s208_s1 = inlined_call_operand.vmem [shape: f32[1,64], index: 1, kind: output, shape index: {}]  }
   0x1   :  { %v101_v0 = vld [vmem:[%s207_s0 + $0xf] sm:$0x1]   ;;  %v103_v1 = vld [vmem:[%s207_s0 + $0xd] sm:$0x1]   ;;  %v102_v2 = vld [vmem:[%s207_s0 + $0xe] sm:$0x1]  }
   0x2   :  { %7 = vrot.lane.b32.xlu0 %v101_v0, %s131_s10  ;;  %19 = vrot.lane.b32.xlu1 %v103_v1, %s132_s11  ;;  %v104_v3 = vld [vmem:[%s207_s0 + $0xc] sm:$0x1]   ;;  %s133_s16 = smov 56   ;;  %s134_s17 = smov 48   ;;  %v105_v4 = vld [vmem:[%s207_s0 + $0xb] sm:$0x1]  }
   0x3   :  { %v106_v5 = vld [vmem:[%s207_s0 + $0xa] sm:$0x1]   ;;  %v2_v6 = vld [vmem:[%s207_s0] sm:$0x1]   ;;  %s135_s24 = smov 44   ;;  %s136_s25 = smov 40  }
   0x4   :  { %4 = vst.msk [vmem:[#allocation0] sm:$0x1] %vm3_vm0, %v2_v6   ;;  %v107_v7 = vld [vmem:[%s207_s0 + $0x9] sm:$0x1]   ;;  %v108_v8 = vld [vmem:[%s207_s0 + $0x8] sm:$0x1]  }
   0x5   :  { %s137_s30 = smov 36   ;;  %s138_s2 = smov 32   ;;  %v109_v9 = vld [vmem:[%s207_s0 + $0x7] sm:$0x1]   ;;  %v110_v10 = vld [vmem:[%s207_s0 + $0x6] sm:$0x1]  }
   0x6   :  { %13 = vrot.lane.b32.xlu0 %v102_v2, %s133_s16  ;;  %25 = vrot.lane.b32.xlu1 %v104_v3, %s134_s17  ;;  %s139_s7 = smov 28   ;;  %s140_s8 = smov 24   ;;  %v111_v11 = vld [vmem:[%s207_s0 + $0x5] sm:$0x1]   ;;  %v112_v12 = vld [vmem:[%s207_s0 + $0x4] sm:$0x1]  }
   0x7   :  { %s141_s13 = smov 20   ;;  %s142_s14 = smov 16   ;;  %v113_v13 = vld [vmem:[%s207_s0 + $0x3] sm:$0x1]   ;;  %v114_v14 = vld [vmem:[%s207_s0 + $0x2] sm:$0x1]  }
   0x8   :  { %s143_s19 = smov 12   ;;  %s144_s20 = smov 8   ;;  %v115_v15 = vld [vmem:[%s207_s0 + $0x1] sm:$0x1]   ;;  %vm27_vm4 = vcmask 425344   ;;  %vm33_vm5 = vcmask 392544  }
   0x9   :  { %s145_s0 = smov 4   ;;  %vm39_vm6 = vcmask 359744   ;;  %vm45_vm7 = vcmask 326944   ;;  %vm51_vm8 = vcmask 294144   ;;  %vm57_vm9 = vcmask 261344  }
   0xa   :  { %31 = vrot.lane.b32.xlu0 %v105_v4, %s135_s24  ;;  %37 = vrot.lane.b32.xlu1 %v106_v5, %s136_s25  ;;  %vm63_vm10 = vcmask 228544   ;;  %vm69_vm11 = vcmask 195744   ;;  %vm75_vm12 = vcmask 162944   ;;  %vm81_vm13 = vcmask 130144  }
   0xb   :  { %vm87_vm14 = vcmask 97344   ;;  %vm93_vm15 = vcmask 64544  }
   0xe   :  { %43 = vrot.lane.b32.xlu0 %v107_v7, %s137_s30  ;;  %49 = vrot.lane.b32.xlu1 %v108_v8, %s138_s2 }
  0x12   :  { %55 = vrot.lane.b32.xlu0 %v109_v9, %s139_s7  ;;  %61 = vrot.lane.b32.xlu1 %v110_v10, %s140_s8 }
  0x16   :  { %67 = vrot.lane.b32.xlu0 %v111_v11, %s141_s13  ;;  %73 = vrot.lane.b32.xlu1 %v112_v12, %s142_s14 }
  0x1a   :  { %79 = vrot.lane.b32.xlu0 %v113_v13, %s143_s19  ;;  %85 = vrot.lane.b32.xlu1 %v114_v14, %s144_s20 }
  0x1e   :  { %91 = vrot.lane.b32.xlu0 %v115_v15, %s145_s0 }
  0x74   :  { %v8_v16 = vpop.permute.xlu0 %7   ;;  %v20_v17 = vpop.permute.xlu1 %19  }
  0x75   :  { %10 = vst.msk [vmem:[#allocation0] sm:$0x1] %vm9_vm1, %v8_v16  }
  0x78   :  { %v14_v18 = vpop.permute.xlu0 %13   ;;  %v26_v19 = vpop.permute.xlu1 %25  }
  0x79   :  { %16 = vst.msk [vmem:[#allocation0] sm:$0x1] %vm15_vm2, %v14_v18  }
  0x7a   :  { %22 = vst.msk [vmem:[#allocation0] sm:$0x1] %vm21_vm3, %v20_v17  }
  0x7b   :  { %28 = vst.msk [vmem:[#allocation0] sm:$0x1] %vm27_vm4, %v26_v19  }
  0x7c   :  { %v32_v20 = vpop.permute.xlu0 %31   ;;  %v38_v21 = vpop.permute.xlu1 %37  }
  0x7d   :  { %34 = vst.msk [vmem:[#allocation0] sm:$0x1] %vm33_vm5, %v32_v20  }
  0x7e   :  { %40 = vst.msk [vmem:[#allocation0] sm:$0x1] %vm39_vm6, %v38_v21  }
  0x80   :  { %v44_v22 = vpop.permute.xlu0 %43   ;;  %v50_v23 = vpop.permute.xlu1 %49  }
  0x81   :  { %46 = vst.msk [vmem:[#allocation0] sm:$0x1] %vm45_vm7, %v44_v22  }
  0x82   :  { %52 = vst.msk [vmem:[#allocation0] sm:$0x1] %vm51_vm8, %v50_v23  }
  0x84   :  { %v56_v24 = vpop.permute.xlu0 %55   ;;  %v62_v25 = vpop.permute.xlu1 %61  }
  0x85   :  { %58 = vst.msk [vmem:[#allocation0] sm:$0x1] %vm57_vm9, %v56_v24  }
  0x86   :  { %64 = vst.msk [vmem:[#allocation0] sm:$0x1] %vm63_vm10, %v62_v25  }
  0x88   :  { %v68_v26 = vpop.permute.xlu0 %67   ;;  %v74_v27 = vpop.permute.xlu1 %73  }
  0x89   :  { %70 = vst.msk [vmem:[#allocation0] sm:$0x1] %vm69_vm11, %v68_v26  }
  0x8a   :  { %76 = vst.msk [vmem:[#allocation0] sm:$0x1] %vm75_vm12, %v74_v27  }
  0x8c   :  { %v80_v28 = vpop.permute.xlu0 %79   ;;  %v86_v29 = vpop.permute.xlu1 %85  }
  0x8d   :  { %82 = vst.msk [vmem:[#allocation0] sm:$0x1] %vm81_vm13, %v80_v28  }
  0x8e   :  { %88 = vst.msk [vmem:[#allocation0] sm:$0x1] %vm87_vm14, %v86_v29  }
  0x90   :  { %v92_v30 = vpop.permute.xlu0 %91  }
  0x91   :  { %94 = vst.msk [vmem:[#allocation0] sm:$0x1] %vm93_vm15, %v92_v30  }
  0x98   :  { %v98_v31 = vld [vmem:[#allocation0] sm:$0x1] }
  0x99   :  { %100 = vst [vmem:[%s208_s1] sm:$0x1] %v98_v31 }

// kernel: _lambda_.1
= control target key start
LH: loop header
LB: loop body
LE: loop exit
PB: predicated region body
PF: predicated region fallthrough
CT: control target
= control target key end

     0   :  { %vm79_vm0 = vcmask 523264   ;;  %vm86_vm1 = vcmask 1046528   ;;  %vm98_vm2 = vcmask 522240   ;;  %v1219_v3 = vmov 0.0|0.0   ;;  %s1220_s27 = smov 64   ;;  %s1623_s0 = inlined_call_operand.vmem [shape: f32[2,16,64], index: 0, kind: input, shape index: {}]   ;;  %s1624_s1 = inlined_call_operand.vmem [shape: f32[192,128], index: 1, kind: input, shape index: {}]   ;;  %s1625_s3 = inlined_call_operand.vmem [shape: f32[128,8], index: 3, kind: input, shape index: {}]   ;;  %s1626_s8 = inlined_call_operand.vmem [shape: f32[128,64], index: 8, kind: input, shape index: {}]   ;;  %s1627_s4 = inlined_call_operand.vmem [shape: f32[8,4], index: 4, kind: input, shape index: {}]   ;;  %s1628_s2 = inlined_call_operand.vmem [shape: f32[1,128], index: 2, kind: input, shape index: {}]   ;;  %s1629_s6 = inlined_call_operand.vmem [shape: f32[4,128], index: 6, kind: input, shape index: {}]   ;;  %s1630_s5 = inlined_call_operand.vmem [shape: f32[1,4], index: 5, kind: input, shape index: {}]   ;;  %s1631_s9 = inlined_call_operand.vmem [shape: f32[1,64], index: 9, kind: input, shape index: {}]   ;;  %s1632_s10 = inlined_call_operand.vmem [shape: f32[64,128], index: 10, kind: input, shape index: {}]   ;;  %s1633_s7 = inlined_call_operand.vmem [shape: f32[1,128], index: 7, kind: input, shape index: {}]   ;;  %s1634_s11 = inlined_call_operand.vmem [shape: f32[1,128], index: 11, kind: input, shape index: {}]   ;;  %s1635_s12 = inlined_call_operand.vmem [shape: f32[2,16,128], index: 12, kind: output, shape index: {}]  }
   0x1   :  { %v1292_v0 = vld [vmem:[%s1623_s0] sm:$0xff]  ;;  %v42_v1 = vld [vmem:[%s1623_s0 + $0x8] sm:$0xff]  ;;  %v1300_v2 = vld [vmem:[%s1623_s0 + $0x10] sm:$0xff]  ;;  %1070 = vmatprep.subr.bf16.mxu0 %v1219_v3  ;;  %vm83_vm3 = vcmask 516096   ;;  %vm66_vm4 = vcmask 1040384   ;;  %v1221_v20 = vmov 0.0  }
   0x2   :  { %49 = vrot.lane.b32.xlu0 %v1292_v0, %s1220_s27  ;;  %v67_v4 = vrot.slane %v1292_v0, 7  ;;  %v87_v5 = vrot.slane %v1292_v0, 1  ;;  %v68_v6 = vrot.slane %v42_v1, 7  ;;  %v88_v7 = vrot.slane %v42_v1, 1  ;;  %53 = vrot.lane.b32.xlu1 %v1300_v2, %s1220_s27  ;;  %v44_v8 = vld [vmem:[%s1623_s0 + $0x18] sm:$0xff]  ;;  %v112_v9 = vld [vmem:[%s1624_s1] sm:$0xff] }
   0x3   :  { %v70_v10 = vrot.slane %v1300_v2, 7  ;;  %v90_v11 = vrot.slane %v1300_v2, 1  ;;  %v71_v12 = vrot.slane %v44_v8, 7  ;;  %v91_v13 = vrot.slane %v44_v8, 1  ;;  %v113_v14 = vld [vmem:[%s1624_s1 + $0x8] sm:$0xff]  ;;  %v114_v17 = vld [vmem:[%s1624_s1 + $0x10] sm:$0xff] }
   0x4   :  { %99 = vst.msk [vmem:[#allocation2 + $0x18] sm:$0x7f] %vm98_vm2, %v88_v7  ;;  %v89_v15 = vsel %vm86_vm1, %v87_v5, %v88_v7  ;;  %v1071_v16 = vpack.c.bf16 %v113_v14, %v112_v9  ;;  %v115_v18 = vld [vmem:[%s1624_s1 + $0x18] sm:$0xff]  ;;  %v1335_v21 = vsel %vm66_vm4, %v67_v4, %v68_v6  ;;  %v116_v24 = vld [vmem:[%s1624_s1 + $0x20] sm:$0xff]  ;;  %v117_v25 = vld [vmem:[%s1624_s1 + $0x28] sm:$0xff]  ;;  %vm61_vm5 = vcmask 1048064  }
   0x5   :  { %97 = vst.msk [vmem:[#allocation2 + $0x8] sm:$0xff] %vm79_vm0, %v89_v15  ;;  %v92_v19 = vsel %vm86_vm1, %v90_v11, %v91_v13  ;;  %v1340_v22 = vsel %vm66_vm4, %v70_v10, %v71_v12  ;;  %v1074_v23 = vpack.c.bf16 %v115_v18, %v114_v17  ;;  %v1077_v26 = vpack.c.bf16 %v117_v25, %v116_v24  ;;  %v244_v27 = vld [vmem:[%s1625_s3] sm:$0xff]  ;;  %v245_v28 = vld [vmem:[%s1625_s3 + $0x8] sm:$0xff]  ;;  %v118_v29 = vld [vmem:[%s1624_s1 + $0x30] sm:$0xff] }
   0x6   :  { %101 = vst.msk [vmem:[#allocation2 + $0x38] sm:$0x7f] %vm98_vm2, %v91_v13  ;;  %51 = vrot.lane.b32.xlu0 %v42_v1, %s1220_s27  ;;  %55 = vrot.lane.b32.xlu1 %v44_v8, %s1220_s27  ;;  %v119_v30 = vld [vmem:[%s1624_s1 + $0x38] sm:$0xff]  ;;  %v1106_v32 = vpack.c.bf16 %v245_v28, %v244_v27  ;;  %v246_v33 = vld [vmem:[%s1625_s3 + $0x10] sm:$0xff]  ;;  %vm77_vm6 = vcmask 523265   ;;  %vm1222_vm7 = vmmov 0  }
   0x7   :  { %102 = vst.msk [vmem:[#allocation2 + $0x1f] sm:$0x1] %vm83_vm3, %v1221_v20  ;;  %103 = vst.msk [vmem:[#allocation2 + $0x3f] sm:$0x1] %vm83_vm3, %v1221_v20  ;;  %1072 = vmatpush1.bf16.msra.mxu0 %v1071_v16  ;;  %v247_v34 = vld [vmem:[%s1625_s3 + $0x18] sm:$0xff]  ;;  %v248_v36 = vld [vmem:[%s1625_s3 + $0x20] sm:$0xff]  ;;  %v1080_v38 = vpack.c.bf16 %v119_v30, %v118_v29 }
   0x8   :  { %100 = vst.msk [vmem:[#allocation2 + $0x28] sm:$0xff] %vm79_vm0, %v92_v19  ;;  %1073 = vmatprep.subr.bf16.mxu0 %v1219_v3  ;;  %1107 = vmatprep.subr.bf16.mxu1 %v1106_v32  ;;  %v1110_v35 = vpack.c.bf16 %v247_v34, %v246_v33  ;;  %v249_v37 = vld [vmem:[%s1625_s3 + $0x28] sm:$0xff]  ;;  %v120_v39 = vld [vmem:[%s1624_s1 + $0x40] sm:$0xff]  ;;  %v250_v42 = vld [vmem:[%s1625_s3 + $0x30] sm:$0xff]  ;;  %vm654_vm8 = vcmask 1041409   ;;  %vm369_vm9 = vcmask 64512  }
   0x9   :  { %1109 = vmatpush3.bf16.msra.mxu1 %v1106_v32  ;;  %v121_v40 = vld [vmem:[%s1624_s1 + $0x48] sm:$0xff]  ;;  %v1114_v41 = vpack.c.bf16 %v249_v37, %v248_v36  ;;  %v251_v43 = vld [vmem:[%s1625_s3 + $0x38] sm:$0xff]  ;;  %v122_v45 = vld [vmem:[%s1624_s1 + $0x50] sm:$0xff]  ;;  %vm516_vm10 = vcmask 1043456   ;;  %vm503_vm11 = vcmask 31744  }
   0xa   :  { %1111 = vmatprep.subr.bf16.mxu1 %v1110_v35  ;;  %v1083_v44 = vpack.c.bf16 %v121_v40, %v120_v39  ;;  %v123_v46 = vld [vmem:[%s1624_s1 + $0x58] sm:$0xff]  ;;  %v1118_v47 = vpack.c.bf16 %v251_v43, %v250_v42  ;;  %v252_v48 = vld [vmem:[%s1625_s3 + $0x40] sm:$0xff]  ;;  %v253_v49 = vld [vmem:[%s1625_s3 + $0x48] sm:$0xff] }
   0xb   :  { %1075 = vmatpush1.bf16.msra.mxu0 %v1074_v23  ;;  %v1086_v50 = vpack.c.bf16 %v123_v46, %v122_v45  ;;  %v124_v51 = vld [vmem:[%s1624_s1 + $0x60] sm:$0xff]  ;;  %v125_v52 = vld [vmem:[%s1624_s1 + $0x68] sm:$0xff]  ;;  %v1122_v53 = vpack.c.bf16 %v253_v49, %v252_v48  ;;  %v254_v54 = vld [vmem:[%s1625_s3 + $0x50] sm:$0xff] }
   0xc   :  { %1076 = vmatprep.subr.bf16.mxu0 %v1219_v3  ;;  %v105_v31 = vld [vmem:[#allocation2 + $0x8] sm:$0xff]  ;;  %v255_v55 = vld [vmem:[%s1625_s3 + $0x58] sm:$0xff]  ;;  %v1089_v56 = vpack.c.bf16 %v125_v52, %v124_v51  ;;  %v126_v57 = vld [vmem:[%s1624_s1 + $0x70] sm:$0xff] }
   0xd   :  { %878 = vmatprep.mubr.msk.f32.mxu0 %vm79_vm0, %v105_v31  ;;  %1113 = vmatpush3.bf16.msra.mxu1 %v1110_v35  ;;  %v127_v58 = vld [vmem:[%s1624_s1 + $0x78] sm:$0xff]  ;;  %v1126_v59 = vpack.c.bf16 %v255_v55, %v254_v54  ;;  %v128_v61 = vld [vmem:[%s1624_s1 + $0x80] sm:$0xff]  ;;  %v129_v62 = vld [vmem:[%s1624_s1 + $0x88] sm:$0xff] }
   0xe   :  { %1115 = vmatprep.subr.bf16.mxu1 %v1114_v41  ;;  %v1092_v60 = vpack.c.bf16 %v127_v58, %v126_v57  ;;  %v1095_v63 = vpack.c.bf16 %v129_v62, %v128_v61  ;;  %v130_v1 = vld [vmem:[%s1624_s1 + $0x90] sm:$0xff]  ;;  %v131_v5 = vld [vmem:[%s1624_s1 + $0x98] sm:$0xff]  ;;  %v132_v7 = vld [vmem:[%s1624_s1 + $0xa0] sm:$0xff] }
   0xf   :  { %1078 = vmatpush1.bf16.msra.mxu0 %v1077_v26  ;;  %v1098_v6 = vpack.c.bf16 %v131_v5, %v130_v1  ;;  %v133_v8 = vld [vmem:[%s1624_s1 + $0xa8] sm:$0xff]  ;;  %v134_v11 = vld [vmem:[%s1624_s1 + $0xb0] sm:$0xff]  ;;  %v135_v12 = vld [vmem:[%s1624_s1 + $0xb8] sm:$0xff] }
  0x10   :  { %1079 = vmatprep.subr.bf16.mxu0 %v1219_v3  ;;  %v1101_v9 = vpack.c.bf16 %v133_v8, %v132_v7  ;;  %v1104_v13 = vpack.c.bf16 %v135_v12, %v134_v11  ;;  %v107_v0 = vld [vmem:[#allocation2 + $0x18] sm:$0xff]  ;;  %v109_v2 = vld [vmem:[#allocation2 + $0x28] sm:$0xff]  ;;  %v629_v25 = vld [vmem:[%s1626_s8] sm:$0xff] }
  0x11   :  { %1117 = vmatpush3.bf16.msra.mxu1 %v1114_v41  ;;  %v111_v19 = vld [vmem:[#allocation2 + $0x38] sm:$0xff]  ;;  %v630_v26 = vld [vmem:[%s1626_s8 + $0x8] sm:$0xff]  ;;  %v258_v28 = vld [vmem:[%s1625_s3 + $0x70] sm:$0xff] }
  0x12   :  { %1119 = vmatprep.subr.bf16.mxu1 %v1118_v47  ;;  %v1139_v27 = vpack.c.bf16 %v630_v26, %v629_v25  ;;  %v259_v29 = vld [vmem:[%s1625_s3 + $0x78] sm:$0xff]  ;;  %v631_v31 = vld [vmem:[%s1626_s8 + $0x10] sm:$0xff]  ;;  %v633_v34 = vld [vmem:[%s1626_s8 + $0x20] sm:$0xff] }
  0x13   :  { %1081 = vmatpush1.bf16.msra.mxu0 %v1080_v38  ;;  %v1134_v30 = vpack.c.bf16 %v259_v29, %v258_v28  ;;  %v632_v32 = vld [vmem:[%s1626_s8 + $0x18] sm:$0xff]  ;;  %v634_v35 = vld [vmem:[%s1626_s8 + $0x28] sm:$0xff]  ;;  %v635_v37 = vld [vmem:[%s1626_s8 + $0x30] sm:$0xff] }
  0x14   :  { %1082 = vmatprep.subr.bf16.mxu0 %v1219_v3  ;;  %v1142_v33 = vpack.c.bf16 %v632_v32, %v631_v31  ;;  %v1145_v36 = vpack.c.bf16 %v634_v35, %v633_v34  ;;  %v636_v38 = vld [vmem:[%s1626_s8 + $0x38] sm:$0xff]  ;;  %v637_v40 = vld [vmem:[%s1626_s8 + $0x40] sm:$0xff]  ;;  %v638_v41 = vld [vmem:[%s1626_s8 + $0x48] sm:$0xff] }
  0x15   :  { %1121 = vmatpush3.bf16.msra.mxu1 %v1118_v47  ;;  %v1148_v39 = vpack.c.bf16 %v636_v38, %v635_v37  ;;  %v1151_v42 = vpack.c.bf16 %v638_v41, %v637_v40  ;;  %v639_v43 = vld [vmem:[%s1626_s8 + $0x50] sm:$0xff]  ;;  %v641_v46 = vld [vmem:[%s1626_s8 + $0x60] sm:$0xff]  ;;  %v642_v47 = vld [vmem:[%s1626_s8 + $0x68] sm:$0xff] }
  0x16   :  { %1123 = vmatprep.subr.bf16.mxu1 %v1122_v53  ;;  %v1157_v48 = vpack.c.bf16 %v642_v47, %v641_v46  ;;  %v643_v49 = vld [vmem:[%s1626_s8 + $0x70] sm:$0xff]  ;;  %v361_v52 = vld [vmem:[%s1627_s4] sm:$0xff] }
  0x17   :  { %1084 = vmatpush1.bf16.msra.mxu0 %v1083_v44  ;;  %v640_v44 = vld [vmem:[%s1626_s8 + $0x58] sm:$0xff]  ;;  %v495_v31 = vld [vmem:[%s1629_s6] sm:$0xf] }
  0x18   :  { %1085 = vmatprep.subr.bf16.mxu0 %v1219_v3  ;;  %v1154_v45 = vpack.c.bf16 %v640_v44, %v639_v43  ;;  %v882_v32 = vld [vmem:[%s1630_s5] ss:$0 sm:$0xff] }
  0x19   :  { %1125 = vmatpush3.bf16.msra.mxu1 %v1122_v53  ;;  %v877_v53 = vld [vmem:[%s1628_s2] ss:$0 sm:$0xff] }
  0x1a   :  { %1127 = vmatprep.subr.bf16.mxu1 %v1126_v59 }
  0x1b   :  { %1087 = vmatpush1.bf16.msra.mxu0 %v1086_v50  ;;  %v644_v50 = vld [vmem:[%s1626_s8 + $0x78] sm:$0xff] }
  0x1c   :  { %1088 = vmatprep.subr.bf16.mxu0 %v1219_v3  ;;  %v1160_v51 = vpack.c.bf16 %v644_v50, %v643_v49 }
  0x1d   :  { %1129 = vmatpush3.bf16.msra.mxu1 %v1126_v59 }
  0x1f   :  { %1090 = vmatpush1.bf16.msra.mxu0 %v1089_v56 }
  0x20   :  { %1091 = vmatprep.subr.bf16.mxu0 %v1219_v3 }
  0x23   :  { %1093 = vmatpush1.bf16.msra.mxu0 %v1092_v60 }
  0x24   :  { %1094 = vmatprep.subr.bf16.mxu0 %v1219_v3 }
  0x27   :  { %1096 = vmatpush1.bf16.msra.mxu0 %v1095_v63 }
  0x28   :  { %1097 = vmatprep.subr.bf16.mxu0 %v1219_v3 }
  0x2b   :  { %1099 = vmatpush1.bf16.msra.mxu0 %v1098_v6 }
  0x2c   :  { %1100 = vmatprep.subr.bf16.mxu0 %v1219_v3 }
  0x2f   :  { %1102 = vmatpush1.bf16.msra.mxu0 %v1101_v9 }
  0x30   :  { %1103 = vmatprep.subr.bf16.mxu0 %v1219_v3 }
  0x33   :  { %1105 = vmatpush1.bf16.msra.mxu0 %v1104_v13 }
  0x34   :  { %1138 = vmatprep.subr.bf16.mxu0 %v1219_v3 }
  0x74   :  { %v50_v14 = vpop.permute.xlu0 %49  ;;  %v54_v15 = vpop.permute.xlu1 %53 }
  0x75   :  { %62 = vst.msk [vmem:[#allocation2] sm:$0xff] %vm61_vm5, %v50_v14  ;;  %64 = vst.msk [vmem:[#allocation2 + $0x20] sm:$0xff] %vm61_vm5, %v54_v15 }
  0x76   :  { %78 = vst.msk [vmem:[#allocation2] sm:$0xfe] %vm77_vm6, %v67_v4  ;;  %81 = vst.msk [vmem:[#allocation2 + $0x20] sm:$0xfe] %vm77_vm6, %v70_v10 }
  0x77   :  { %84 = vst.msk [vmem:[#allocation2] sm:$0x1] %vm83_vm3, %v1221_v20  ;;  %85 = vst.msk [vmem:[#allocation2 + $0x20] sm:$0x1] %vm83_vm3, %v1221_v20 }
  0x78   :  { %v52_v16 = vpop.permute.xlu0 %51  ;;  %v56_v17 = vpop.permute.xlu1 %55 }
  0x79   :  { %63 = vst.msk [vmem:[#allocation2 + $0x10] sm:$0xff] %vm61_vm5, %v52_v16  ;;  %65 = vst.msk [vmem:[#allocation2 + $0x30] sm:$0xff] %vm61_vm5, %v56_v17 }
  0x7a   :  { %80 = vst.msk [vmem:[#allocation2 + $0x10] sm:$0xff] %vm79_vm0, %v1335_v21  ;;  %82 = vst.msk [vmem:[#allocation2 + $0x30] sm:$0xff] %vm79_vm0, %v1340_v22  ;;  %v256_v21 = vld [vmem:[%s1625_s3 + $0x60] sm:$0xff]  ;;  %v257_v22 = vld [vmem:[%s1625_s3 + $0x68] sm:$0xff] }
  0x7b   :  { %v1130_v24 = vpack.c.bf16 %v257_v22, %v256_v21 }
  0x7d   :  { %1131 = vmatprep.subr.bf16.mxu1 %v1130_v24 }
  0x7e   :  { %v104_v4 = vld [vmem:[#allocation2] sm:$0xff]  ;;  %1133 = vmatpush3.bf16.msra.mxu1 %v1130_v24 }
  0x7f   :  { %220 = vmatmul.mubr.f32.vlgmr.msra.gmra.mrb[0].mxu0 %v104_v4  ;;  %v108_v18 = vld [vmem:[#allocation2 + $0x20] sm:$0xff]  ;;  %1135 = vmatprep.subr.bf16.mxu1 %v1134_v30 }
  0x80   :  { %879 = vmatprep.mubr.msk.f32.mxu0 %vm79_vm0, %v107_v0  ;;  %1140 = vmatpush3.bf16.msra.mxu0 %v1139_v27 }
  0x81   :  { %v106_v10 = vld [vmem:[#allocation2 + $0x10] sm:$0xff]  ;;  %1141 = vmatprep.subr.bf16.mxu0 %v1219_v3 }
  0x82   :  { %v110_v23 = vld [vmem:[#allocation2 + $0x30] sm:$0xff]  ;;  %1137 = vmatpush3.bf16.msra.mxu1 %v1134_v30 }
  0x83   :  { %225 = vmatmul.mubr.f32.gmra.mrb[2].mxu0 %v106_v10  ;;  %1000 = vmatprep.subr.mxu1 %v361_v52 }
  0x84   :  { %880 = vmatprep.mubr.msk.f32.mxu0 %vm79_vm0, %v109_v2  ;;  %1143 = vmatpush3.bf16.msra.mxu0 %v1142_v33 }
  0x85   :  { %1144 = vmatprep.subr.bf16.mxu0 %v1219_v3 }
  0x87   :  { %230 = vmatmul.mubr.f32.gmra.mrb[4].mxu0 %v108_v18 }
  0x88   :  { %881 = vmatprep.mubr.msk.f32.mxu0 %vm79_vm0, %v111_v19  ;;  %1146 = vmatpush3.bf16.msra.mxu0 %v1145_v36 }
  0x89   :  { %1147 = vmatprep.subr.bf16.mxu0 %v1219_v3 }
  0x8b   :  { %235 = vmatmul.mubr.f32.gmra.mrb[6].mxu0 %v110_v23 }
  0x8c   :  { %1149 = vmatpush3.bf16.msra.mxu0 %v1148_v39  ;;  %1048 = vmatprep.mubr.msk.f32.mxu0 %vm1222_vm7, %v1221_v20  ;;  %v901_v39 = vld [vmem:[%s1631_s9] ss:$0 sm:$0xff] }
  0x8d   :  { %1150 = vmatprep.subr.bf16.mxu0 %v1219_v3 }
  0x90   :  { %1152 = vmatpush3.bf16.msra.mxu0 %v1151_v42 }
  0x91   :  { %1153 = vmatprep.subr.bf16.mxu0 %v1219_v3 }
  0x94   :  { %1155 = vmatpush3.bf16.msra.mxu0 %v1154_v45 }
  0x95   :  { %1156 = vmatprep.subr.bf16.mxu0 %v1219_v3 }
  0x98   :  { %1158 = vmatpush3.bf16.msra.mxu0 %v1157_v48 }
  0x99   :  { %1159 = vmatprep.subr.bf16.mxu0 %v1219_v3 }
  0x9c   :  { %1161 = vmatpush3.bf16.msra.mxu0 %v1160_v51 }
 0x152   :  { %v221_v54 = vpop.f32.mrb[0].mxu0 }
 0x153   :  { %v222_v55 = vadd.f32 %v877_v53, %v221_v54  ;;  %v223_v56 = vpop.f32.mrb[1].mxu0 }
 0x155   :  { %v1541_v57 = vmax.f32 %v222_v55, 0.0 }
 0x156   :  { %v226_v58 = vpop.f32.mrb[2].mxu0 }
 0x157   :  { %v227_v59 = vadd.f32 %v877_v53, %v226_v58  ;;  %v228_v60 = vpop.f32.mrb[3].mxu0  ;;  %994 = vmatprep.mubr.f32.mxu1 %v1541_v57  ;;  %v734_v58 = vld [vmem:[%s1632_s10] sm:$0xff] }
 0x159   :  { %v1544_v61 = vmax.f32 %v227_v59, 0.0  ;;  %v735_v59 = vld [vmem:[%s1632_s10 + $0x8] sm:$0xff] }
 0x15a   :  { %v231_v62 = vpop.f32.mrb[4].mxu0 }
 0x15b   :  { %v345_v63 = vadd.f32 %v1544_v61, %v1541_v57  ;;  %995 = vmatmul.mubr.f32.vlgmr.msra.gmra.mrb[0].mxu1 %v1544_v61  ;;  %v232_v1 = vadd.f32 %v877_v53, %v231_v62  ;;  %v233_v5 = vpop.f32.mrb[5].mxu0 }
 0x15c   :  { %1001 = vmatpush3.msra.mxu1 %v361_v52  ;;  %v1163_v5 = vpack.c.bf16 %v735_v59, %v734_v58 }
 0x15d   :  { %v346_v6 = vrot.slane %v345_v63, 4  ;;  %v1549_v7 = vmax.f32 %v232_v1, 0.0  ;;  %1008 = vmatprep.subr.msk.mxu1 %vm516_vm10, %v495_v31 }
 0x15e   :  { %v236_v8 = vpop.f32.mrb[6].mxu0 }
 0x15f   :  { %v347_v9 = vadd.f32 %v346_v6, %v345_v63  ;;  %v237_v11 = vadd.f32 %v877_v53, %v236_v8  ;;  %v238_v12 = vpop.f32.mrb[7].mxu0  ;;  %997 = vmatprep.mubr.f32.mxu1 %v1549_v7  ;;  %v736_v8 = vld [vmem:[%s1632_s10 + $0x10] sm:$0xff] }
 0x160   :  { %v738_v12 = vld [vmem:[%s1632_s10 + $0x20] sm:$0xff] }
 0x161   :  { %v348_v13 = vrot.slane %v347_v9, 2  ;;  %v1552_v14 = vmax.f32 %v237_v11, 0.0 }
 0x163   :  { %v352_v15 = vadd.f32 %v1552_v14, %v1549_v7  ;;  %998 = vmatmul.mubr.f32.gmra.mrb[2].mxu1 %v1552_v14  ;;  %v349_v16 = vadd.f32 %v348_v13, %v347_v9  ;;  %v737_v9 = vld [vmem:[%s1632_s10 + $0x18] sm:$0xff]  ;;  %v739_v13 = vld [vmem:[%s1632_s10 + $0x28] sm:$0xff] }
 0x164   :  { %v1166_v11 = vpack.c.bf16 %v737_v9, %v736_v8 }
 0x165   :  { %v353_v17 = vrot.slane %v352_v15, 4  ;;  %v350_v4 = vrot.slane %v349_v16, 1 }
 0x167   :  { %v354_v0 = vadd.f32 %v353_v17, %v352_v15  ;;  %v351_v19 = vadd.f32 %v350_v4, %v349_v16 }
 0x169   :  { %v355_v2 = vrot.slane %v354_v0, 2  ;;  %v359_v21 = vmul.f32 0.0625, %v351_v19 }
 0x16b   :  { %v356_v10 = vadd.f32 %v355_v2, %v354_v0  ;;  %v1169_v0 = vpack.c.bf16 %v739_v13, %v738_v12  ;;  %v740_v2 = vld [vmem:[%s1632_s10 + $0x30] sm:$0xff] }
 0x16d   :  { %v357_v18 = vrot.slane %v356_v10, 1 }
 0x16f   :  { %v358_v23 = vadd.f32 %v357_v18, %v356_v10  ;;  %v741_v10 = vld [vmem:[%s1632_s10 + $0x38] sm:$0xff] }
 0x170   :  { %v1172_v18 = vpack.c.bf16 %v741_v10, %v740_v2 }
 0x171   :  { %v360_v22 = vmul.f32 0.0625, %v358_v23 }
 0x173   :  { %v655_v24 = vsel %vm654_vm8, %v360_v22, %v359_v21 }
 0x174   :  { %1049 = vmatmul.mubr.f32.vlgmr.msra.gmra.mrb[8].mxu0 %v655_v24  ;;  %v891_v24 = vld [vmem:[%s1633_s7] ss:$0 sm:$0xff] }
 0x22e   :  { %v996_v25 = vpop.f32.mrb[0].mxu1 }
 0x22f   :  { %v326_v26 = vpop.f32.mrb[1].mxu1 }
 0x230   :  { %1002 = vmatprep.mubr.msk.f32.mxu1 %vm369_vm9, %v326_v26 }
 0x231   :  { %1003 = vmatmul.mubr.msk.f32.vlgmr.msra.gmra.mrb[4].mxu1 %vm369_vm9, %v996_v25 }
 0x232   :  { %1009 = vmatpush3.msk.msra.mxu1 %vm516_vm10, %v495_v31 }
 0x233   :  { %1162 = vmatprep.subr.bf16.mxu1 %v1219_v3 }
 0x236   :  { %v999_v27 = vpop.f32.mrb[2].mxu1 }
 0x237   :  { %v336_v28 = vpop.f32.mrb[3].mxu1 }
 0x238   :  { %1005 = vmatprep.mubr.msk.f32.mxu1 %vm369_vm9, %v336_v28 }
 0x239   :  { %1006 = vmatmul.mubr.msk.f32.gmra.mrb[6].mxu1 %vm369_vm9, %v999_v27 }
 0x247   :  { %v723_v29 = vpop.f32.mrb[8].mxu0 }
 0x248   :  { %v1050_v30 = vpop.f32.mrb[9].mxu0  ;;  %v724_v41 = vadd.f32 %v901_v39, %v723_v29 }
 0x24a   :  { %v902_v47 = vmul.f32 -1.442695, %v724_v41 }
 0x304   :  { %v1004_v33 = vpop.f32.mrb[4].mxu1 }
 0x305   :  { %v454_v34 = vadd.f32 %v1004_v33, %v882_v32  ;;  %v448_v35 = vpop.f32.mrb[5].mxu1 }
 0x306   :  { %v449_v36 = vadd.f32 %v882_v32, %v448_v35 }
 0x307   :  { %v888_v37 = vmul.f32 -1.442695, %v454_v34 }
 0x308   :  { %v887_v38 = vmul.f32 -1.442695, %v449_v36 }
 0x309   :  { %1179 = vpow2.f32 %v888_v37 }
 0x30a   :  { %1181 = vpow2.f32 %v887_v38 }
 0x30c   :  { %v1007_v40 = vpop.f32.mrb[6].mxu1 }
 0x30d   :  { %v464_v42 = vadd.f32 %v1007_v40, %v882_v32  ;;  %v458_v43 = vpop.f32.mrb[7].mxu1 }
 0x30e   :  { %v459_v44 = vadd.f32 %v882_v32, %v458_v43 }
 0x30f   :  { %v890_v45 = vmul.f32 -1.442695, %v464_v42 }
 0x310   :  { %v889_v46 = vmul.f32 -1.442695, %v459_v44 }
 0x311   :  { %1183 = vpow2.f32 %v890_v45 }
 0x312   :  { %1185 = vpow2.f32 %v889_v46 }
 0x313   :  { %v1180_v48 = vpop.eup %1179  ;;  %1187 = vpow2.f32 %v902_v47  ;;  %v1223_v47 = vmov 1966171168  }
 0x314   :  { %v1182_v49 = vpop.eup %1181  ;;  %v480_v50 = vadd.f32 1.0, %v1180_v48  ;;  %v834_v48 = vunpack.c.l.s4 %v1223_v47 }
 0x315   :  { %v479_v51 = vadd.f32 1.0, %v1182_v49  ;;  %v836_v49 = vlaneseq }
 0x316   :  { %1189 = vrcp.f32 %v480_v50 }
 0x317   :  { %1191 = vrcp.f32 %v479_v51  ;;  %v835_v51 = vunpack.c.0.s8 %v834_v48 }
 0x31b   :  { %v1184_v52 = vpop.eup %1183 }
 0x31c   :  { %v1186_v53 = vpop.eup %1185  ;;  %v482_v54 = vadd.f32 1.0, %v1184_v52  ;;  %v837_v52 = vshrl.u32 %v836_v49, 7 }
 0x31d   :  { %v481_v55 = vadd.f32 1.0, %v1186_v53  ;;  %v1188_v56 = vpop.eup %1187 }
 0x31e   :  { %1193 = vrcp.f32 %v482_v54  ;;  %v730_v63 = vadd.f32 1.0, %v1188_v56  ;;  %v838_v53 = vsub.s32 %v835_v51, %v837_v52  ;;  %v857_v58 = vsub.s32 0, %v837_v52 }
 0x31f   :  { %1195 = vrcp.f32 %v481_v55 }
 0x320   :  { %v1190_v60 = vpop.eup %1189  ;;  %1197 = vrcp.f32 %v730_v63 }
 0x321   :  { %v1192_v62 = vpop.eup %1191  ;;  %v492_v6 = vmul.f32 %v1190_v60, %v454_v34 }
 0x322   :  { %v491_v1 = vmul.f32 %v1192_v62, %v449_v36 }
 0x324   :  { %1010 = vmatprep.mubr.msk.f32.mxu1 %vm503_vm11, %v491_v1 }
 0x325   :  { %1011 = vmatmul.mubr.msk.f32.vlgmr.msra.gmra.mrb[8].mxu1 %vm503_vm11, %v492_v6 }
 0x326   :  { %1164 = vmatpush3.bf16.msra.mxu1 %v1163_v5 }
 0x327   :  { %1165 = vmatprep.subr.bf16.mxu1 %v1219_v3 }
 0x328   :  { %v1194_v15 = vpop.eup %1193 }
 0x329   :  { %v1196_v16 = vpop.eup %1195  ;;  %v494_v4 = vmul.f32 %v1194_v15, %v464_v42 }
 0x32a   :  { %v493_v17 = vmul.f32 %v1196_v16, %v459_v44  ;;  %1167 = vmatpush3.bf16.msra.mxu1 %v1166_v11  ;;  %v1198_v19 = vpop.eup %1197 }
 0x32b   :  { %1168 = vmatprep.subr.bf16.mxu1 %v1219_v3  ;;  %v733_v23 = vmul.f32 %v1198_v19, %v724_v41 }
 0x32c   :  { %1013 = vmatprep.mubr.msk.f32.mxu1 %vm503_vm11, %v493_v17 }
 0x32d   :  { %1014 = vmatmul.mubr.msk.f32.gmra.mrb[10].mxu1 %vm503_vm11, %v494_v4 }
 0x32e   :  { %1170 = vmatpush3.bf16.msra.mxu1 %v1169_v0  ;;  %1067 = vmatprep.mubr.msk.f32.mxu1 %vm1222_vm7, %v1221_v20 }
 0x32f   :  { %1171 = vmatprep.subr.bf16.mxu1 %v1219_v3  ;;  %v903_v3 = vld [vmem:[%s1634_s11] ss:$0 sm:$0xff] }
 0x332   :  { %1173 = vmatpush3.bf16.msra.mxu1 %v1172_v18 }
 0x335   :  { %1068 = vmatmul.mubr.msk.f32.vlgmr.msra.gmra.mrb[12].mxu1 %vm79_vm0, %v733_v23 }
 0x3f8   :  { %v1012_v21 = vpop.f32.mrb[8].mxu1 }
 0x3f9   :  { %v586_v22 = vpop.f32.mrb[9].mxu1  ;;  %v592_v26 = vadd.f32 %v1012_v21, %v891_v24 }
 0x3fa   :  { %v587_v28 = vadd.f32 %v891_v24, %v586_v22 }
 0x3fb   :  { %v898_v20 = vmul.f32 -1.442695, %v592_v26 }
 0x3fc   :  { %v897_v31 = vmul.f32 -1.442695, %v587_v28 }
 0x3fd   :  { %1199 = vpow2.f32 %v898_v20 }
 0x3fe   :  { %1201 = vpow2.f32 %v897_v31 }
 0x400   :  { %v1015_v25 = vpop.f32.mrb[10].mxu1 }
 0x401   :  { %v596_v27 = vpop.f32.mrb[11].mxu1  ;;  %v602_v29 = vadd.f32 %v1015_v25, %v891_v24 }
 0x402   :  { %v597_v30 = vadd.f32 %v891_v24, %v596_v27 }
 0x403   :  { %v900_v32 = vmul.f32 -1.442695, %v602_v29 }
 0x404   :  { %v899_v33 = vmul.f32 -1.442695, %v597_v30 }
 0x405   :  { %1203 = vpow2.f32 %v900_v32 }
 0x406   :  { %1205 = vpow2.f32 %v899_v33 }
 0x407   :  { %v1200_v38 = vpop.eup %1199 }
 0x408   :  { %v818_v34 = vpop.f32.mrb[12].mxu1  ;;  %v1202_v39 = vpop.eup %1201  ;;  %v618_v43 = vadd.f32 1.0, %v1200_v38 }
 0x409   :  { %v819_v35 = vadd.f32 %v903_v3, %v818_v34  ;;  %v1069_v36 = vpop.f32.mrb[13].mxu1  ;;  %v617_v44 = vadd.f32 1.0, %v1202_v39 }
 0x40b   :  { %v905_v37 = vmul.f32 -1.442695, %v819_v35 }
 0x40d   :  { %1207 = vpow2.f32 %v905_v37 }
 0x40f   :  { %v1204_v40 = vpop.eup %1203 }
 0x410   :  { %v1206_v41 = vpop.eup %1205  ;;  %v620_v46 = vadd.f32 1.0, %v1204_v40 }
 0x411   :  { %v619_v50 = vadd.f32 1.0, %v1206_v41 }
 0x417   :  { %v1208_v42 = vpop.eup %1207 }
 0x418   :  { %v825_v45 = vadd.f32 1.0, %v1208_v42 }
 0x41a   :  { %1209 = vrcp.f32 %v825_v45 }
 0x41b   :  { %1211 = vrcp.f32 %v618_v43 }
 0x41c   :  { %1213 = vrcp.f32 %v617_v44 }
 0x41d   :  { %1215 = vrcp.f32 %v620_v46 }
 0x41e   :  { %1217 = vrcp.f32 %v619_v50 }
 0x424   :  { %v1210_v54 = vpop.eup %1209 }
 0x425   :  { %v1212_v55 = vpop.eup %1211  ;;  %v839_v56 = vrot.slane %v1210_v54, %v838_v53 }
 0x426   :  { %v1214_v59 = vpop.eup %1213  ;;  %v829_v5 = vmul.f32 %v1212_v55, %v1544_v61 }
 0x427   :  { %v1216_v60 = vpop.eup %1215  ;;  %v840_v62 = vcombine.high %v839_v56, %v839_v56  ;;  %v847_v63 = vrot.slane %v839_v56, %v838_v53  ;;  %v828_v6 = vmul.f32 %v1214_v59, %v1541_v57 }
 0x428   :  { %v1218_v1 = vpop.eup %1217  ;;  %v831_v11 = vmul.f32 %v1216_v60, %v1552_v14 }
 0x429   :  { %v854_v8 = vrot.slane %v840_v62, %v838_v53  ;;  %v858_v9 = vrot.slane %v847_v63, %v857_v58  ;;  %v830_v12 = vmul.f32 %v1218_v1, %v1549_v7 }
 0x42b   :  { %v862_v13 = vrot.slane %v854_v8, %v857_v58  ;;  %v865_v15 = vmul.f32 %v858_v9, %v828_v6  ;;  %v866_v16 = vmul.f32 %v858_v9, %v829_v5 }
 0x42d   :  { %v867_v17 = vmul.f32 %v862_v13, %v830_v12  ;;  %v868_v0 = vmul.f32 %v862_v13, %v831_v11  ;;  %869 = vst [vmem:[%s1635_s12] sm:$0xff] %v865_v15  ;;  %870 = vst [vmem:[%s1635_s12 + $0x8] sm:$0xff] %v866_v16 }
 0x42f   :  { %871 = vst [vmem:[%s1635_s12 + $0x10] sm:$0xff] %v867_v17  ;;  %872 = vst [vmem:[%s1635_s12 + $0x18] sm:$0xff] %v868_v0 }

// kernel: tile.37
= control target key start
LH: loop header
LB: loop body
LE: loop exit
PB: predicated region body
PF: predicated region fallthrough
CT: control target
= control target key end

     0   :  { %vm6_vm0 = vcmask 1043458   ;;  %s11_s6 = smov 3  ;;  %s14_s7 = smov 12  ;;  %vm8_vm1 = vcmask 64512   ;;  %vm20_vm2 = vcmask 1048512   ;;  %vm32_vm3 = vcmask 982912   ;;  %s381_s0 = inlined_call_operand.vmem [shape: f32[4,16,8], index: 0, kind: input, shape index: {}]   ;;  %s382_s1 = inlined_call_operand.vmem [shape: f32[4,128], index: 1, kind: output, shape index: {}]  }
   0x1   :  { %v196_v0 = vld [vmem:[%s381_s0 + $0xf] ss:$16 sm:%s11_s6]   ;;  %s35_s12 = smov 3  ;;  %s38_s15 = smov 12  ;;  %vm44_vm4 = vcmask 917312   ;;  %vm56_vm5 = vcmask 851712  }
   0x2   :  { %v197_v1 = vld [vmem:[%s381_s0 + $0xf] ss:$16 sm:%s14_s7]   ;;  %v200_v3 = vld [vmem:[%s381_s0 + $0xd] ss:$16 sm:%s35_s12]   ;;  %s241_s16 = smov 120   ;;  %s23_s19 = smov 3 }
   0x3   :  { %v17_v2 = vsel %vm6_vm0, %v197_v1, %v196_v0  ;;  %v201_v4 = vld [vmem:[%s381_s0 + $0xd] ss:$16 sm:%s38_s15]   ;;  %s26_s20 = smov 12  ;;  %v198_v6 = vld [vmem:[%s381_s0 + $0xe] ss:$16 sm:%s23_s19]   ;;  %s47_s25 = smov 3 }
   0x4   :  { %18 = vrot.lane.b32.xlu0 %v17_v2, %s241_s16  ;;  %v41_v5 = vsel %vm6_vm0, %v201_v4, %v200_v3  ;;  %v199_v7 = vld [vmem:[%s381_s0 + $0xe] ss:$16 sm:%s26_s20]   ;;  %s242_s26 = smov 104   ;;  %s50_s29 = smov 12  ;;  %vm68_vm6 = vcmask 786112   ;;  %vm80_vm7 = vcmask 720512  }
   0x5   :  { %42 = vrot.lane.b32.xlu1 %v41_v5, %s242_s26  ;;  %v29_v8 = vsel %vm6_vm0, %v199_v7, %v198_v6  ;;  %v202_v9 = vld [vmem:[%s381_s0 + $0xc] ss:$16 sm:%s47_s25]   ;;  %s59_s3 = smov 3  ;;  %s62_s4 = smov 12  ;;  %vm92_vm8 = vcmask 654912   ;;  %vm104_vm9 = vcmask 589312  }
   0x6   :  { %v203_v10 = vld [vmem:[%s381_s0 + $0xc] ss:$16 sm:%s50_s29]   ;;  %s243_s5 = smov 112   ;;  %v204_v12 = vld [vmem:[%s381_s0 + $0xb] ss:$16 sm:%s59_s3]   ;;  %s71_s8 = smov 3 }
   0x7   :  { %v53_v11 = vsel %vm6_vm0, %v203_v10, %v202_v9  ;;  %v205_v13 = vld [vmem:[%s381_s0 + $0xb] ss:$16 sm:%s62_s4]   ;;  %v206_v14 = vld [vmem:[%s381_s0 + $0xa] ss:$16 sm:%s71_s8]   ;;  %s74_s13 = smov 12  ;;  %s244_s14 = smov 96  }
   0x8   :  { %30 = vrot.lane.b32.xlu0 %v29_v8, %s243_s5  ;;  %v65_v15 = vsel %vm6_vm0, %v205_v13, %v204_v12  ;;  %v207_v16 = vld [vmem:[%s381_s0 + $0xa] ss:$16 sm:%s74_s13]   ;;  %s83_s17 = smov 3  ;;  %s86_s18 = smov 12  ;;  %vm116_vm10 = vcmask 523712   ;;  %vm128_vm11 = vcmask 458112  }
   0x9   :  { %54 = vrot.lane.b32.xlu1 %v53_v11, %s244_s14  ;;  %v77_v17 = vsel %vm6_vm0, %v207_v16, %v206_v14  ;;  %v208_v18 = vld [vmem:[%s381_s0 + $0x9] ss:$16 sm:%s83_s17]   ;;  %s95_s23 = smov 3  ;;  %s245_s24 = smov 88   ;;  %vm140_vm12 = vcmask 392512   ;;  %vm152_vm13 = vcmask 326912  }
   0xa   :  { %v209_v19 = vld [vmem:[%s381_s0 + $0x9] ss:$16 sm:%s86_s18]   ;;  %v210_v20 = vld [vmem:[%s381_s0 + $0x8] ss:$16 sm:%s95_s23]   ;;  %s98_s27 = smov 12  ;;  %s107_s30 = smov 3 }
   0xb   :  { %v89_v21 = vsel %vm6_vm0, %v209_v19, %v208_v18  ;;  %v211_v22 = vld [vmem:[%s381_s0 + $0x8] ss:$16 sm:%s98_s27]   ;;  %s110_s2 = smov 12  ;;  %s246_s3 = smov 80   ;;  %v212_v23 = vld [vmem:[%s381_s0 + $0x7] ss:$16 sm:%s107_s30]  }
   0xc   :  { %66 = vrot.lane.b32.xlu0 %v65_v15, %s245_s24  ;;  %s119_s6 = smov 3  ;;  %v101_v24 = vsel %vm6_vm0, %v211_v22, %v210_v20  ;;  %v213_v25 = vld [vmem:[%s381_s0 + $0x7] ss:$16 sm:%s110_s2]   ;;  %s122_s11 = smov 12  ;;  %vm164_vm14 = vcmask 261312   ;;  %vm176_vm15 = vcmask 195712  }
   0xd   :  { %78 = vrot.lane.b32.xlu1 %v77_v17, %s246_s3  ;;  %v214_v26 = vld [vmem:[%s381_s0 + $0x6] ss:$16 sm:%s119_s6]   ;;  %s247_s12 = smov 72   ;;  %s131_s15 = smov 3  ;;  %v113_v28 = vsel %vm6_vm0, %v213_v25, %v212_v23 }
   0xe   :  { %v215_v27 = vld [vmem:[%s381_s0 + $0x6] ss:$16 sm:%s122_s11]   ;;  %s134_s16 = smov 12  ;;  %v216_v29 = vld [vmem:[%s381_s0 + $0x5] ss:$16 sm:%s131_s15]   ;;  %s143_s19 = smov 3 }
   0xf   :  { %s248_s20 = smov 64   ;;  %v217_v30 = vld [vmem:[%s381_s0 + $0x5] ss:$16 sm:%s134_s16]   ;;  %s146_s23 = smov 12  ;;  %v125_v31 = vsel %vm6_vm0, %v215_v27, %v214_v26  ;;  %v218_v32 = vld [vmem:[%s381_s0 + $0x4] ss:$16 sm:%s143_s19]  }
  0x10   :  { %90 = vrot.lane.b32.xlu0 %v89_v21, %s247_s12  ;;  %s155_s26 = smov 3  ;;  %s158_s27 = smov 12  ;;  %v219_v33 = vld [vmem:[%s381_s0 + $0x4] ss:$16 sm:%s146_s23]   ;;  %v137_v34 = vsel %vm6_vm0, %v217_v30, %v216_v29 }
  0x11   :  { %102 = vrot.lane.b32.xlu1 %v101_v24, %s248_s20  ;;  %s249_s28 = smov 56   ;;  %s167_s2 = smov 3  ;;  %v220_v35 = vld [vmem:[%s381_s0 + $0x3] ss:$16 sm:%s155_s26]   ;;  %v149_v37 = vsel %vm6_vm0, %v219_v33, %v218_v32 }
  0x12   :  { %s170_s5 = smov 12  ;;  %s250_s6 = smov 48   ;;  %v221_v36 = vld [vmem:[%s381_s0 + $0x3] ss:$16 sm:%s158_s27]   ;;  %v222_v38 = vld [vmem:[%s381_s0 + $0x2] ss:$16 sm:%s167_s2]  }
  0x13   :  { %s179_s9 = smov 3  ;;  %v223_v39 = vld [vmem:[%s381_s0 + $0x2] ss:$16 sm:%s170_s5]   ;;  %s182_s14 = smov 12  ;;  %v161_v41 = vsel %vm6_vm0, %v221_v36, %v220_v35 }
  0x14   :  { %114 = vrot.lane.b32.xlu0 %v113_v28, %s249_s28  ;;  %s2_s15 = smov 3  ;;  %s251_s16 = smov 40   ;;  %v224_v42 = vld [vmem:[%s381_s0 + $0x1] ss:$16 sm:%s179_s9]   ;;  %v173_v46 = vsel %vm6_vm0, %v223_v39, %v222_v38 }
  0x15   :  { %126 = vrot.lane.b32.xlu1 %v125_v31, %s250_s6  ;;  %v3_v40 = vld [vmem:[%s381_s0] ss:$16 sm:%s2_s15]   ;;  %s4_s19 = smov 12  ;;  %s252_s24 = smov 32  }
  0x16   :  { %v5_v43 = vld [vmem:[%s381_s0] ss:$16 sm:%s4_s19]   ;;  %v225_v44 = vld [vmem:[%s381_s0 + $0x1] ss:$16 sm:%s182_s14]   ;;  %s253_s0 = smov 24   ;;  %s254_s27 = smov 16  }
  0x17   :  { %v7_v45 = vsel %vm6_vm0, %v5_v43, %v3_v40  ;;  %v185_v47 = vsel %vm6_vm0, %v225_v44, %v224_v42  ;;  %s255_s28 = smov 8   ;;  %vm188_vm0 = vcmask 130112  }
  0x18   :  { %138 = vrot.lane.b32.xlu0 %v137_v34, %s251_s16  ;;  %9 = vst.msk [vmem:[#allocation0] sm:$0xf] %vm8_vm1, %v7_v45  }
  0x19   :  { %150 = vrot.lane.b32.xlu1 %v149_v37, %s252_s24 }
  0x1c   :  { %162 = vrot.lane.b32.xlu0 %v161_v41, %s253_s0 }
  0x1d   :  { %174 = vrot.lane.b32.xlu1 %v173_v46, %s254_s27 }
  0x20   :  { %186 = vrot.lane.b32.xlu0 %v185_v47, %s255_s28 }
  0x76   :  { %v19_v48 = vpop.permute.xlu0 %18  }
  0x77   :  { %21 = vst.msk [vmem:[#allocation0] sm:$0xf] %vm20_vm2, %v19_v48   ;;  %v43_v49 = vpop.permute.xlu1 %42  }
  0x7a   :  { %v31_v50 = vpop.permute.xlu0 %30  }
  0x7b   :  { %33 = vst.msk [vmem:[#allocation0] sm:$0xf] %vm32_vm3, %v31_v50   ;;  %v55_v51 = vpop.permute.xlu1 %54  }
  0x7c   :  { %45 = vst.msk [vmem:[#allocation0] sm:$0xf] %vm44_vm4, %v43_v49  }
  0x7d   :  { %57 = vst.msk [vmem:[#allocation0] sm:$0xf] %vm56_vm5, %v55_v51  }
  0x7e   :  { %v67_v52 = vpop.permute.xlu0 %66  }
  0x7f   :  { %69 = vst.msk [vmem:[#allocation0] sm:$0xf] %vm68_vm6, %v67_v52   ;;  %v79_v53 = vpop.permute.xlu1 %78  }
  0x80   :  { %81 = vst.msk [vmem:[#allocation0] sm:$0xf] %vm80_vm7, %v79_v53  }
  0x82   :  { %v91_v54 = vpop.permute.xlu0 %90  }
  0x83   :  { %93 = vst.msk [vmem:[#allocation0] sm:$0xf] %vm92_vm8, %v91_v54   ;;  %v103_v55 = vpop.permute.xlu1 %102  }
  0x84   :  { %105 = vst.msk [vmem:[#allocation0] sm:$0xf] %vm104_vm9, %v103_v55  }
  0x86   :  { %v115_v56 = vpop.permute.xlu0 %114  }
  0x87   :  { %117 = vst.msk [vmem:[#allocation0] sm:$0xf] %vm116_vm10, %v115_v56   ;;  %v127_v57 = vpop.permute.xlu1 %126  }
  0x88   :  { %129 = vst.msk [vmem:[#allocation0] sm:$0xf] %vm128_vm11, %v127_v57  }
  0x8a   :  { %v139_v58 = vpop.permute.xlu0 %138  }
  0x8b   :  { %141 = vst.msk [vmem:[#allocation0] sm:$0xf] %vm140_vm12, %v139_v58   ;;  %v151_v59 = vpop.permute.xlu1 %150  }
  0x8c   :  { %153 = vst.msk [vmem:[#allocation0] sm:$0xf] %vm152_vm13, %v151_v59  }
  0x8e   :  { %v163_v60 = vpop.permute.xlu0 %162  }
  0x8f   :  { %165 = vst.msk [vmem:[#allocation0] sm:$0xf] %vm164_vm14, %v163_v60   ;;  %v175_v61 = vpop.permute.xlu1 %174  }
  0x90   :  { %177 = vst.msk [vmem:[#allocation0] sm:$0xf] %vm176_vm15, %v175_v61  }
  0x92   :  { %v187_v62 = vpop.permute.xlu0 %186  }
  0x93   :  { %189 = vst.msk [vmem:[#allocation0] sm:$0xf] %vm188_vm0, %v187_v62  }
  0x9a   :  { %v193_v63 = vld [vmem:[#allocation0] sm:$0xf] }
  0x9b   :  { %195 = vst [vmem:[%s382_s1] sm:$0xf] %v193_v63 }

// kernel: tile.32
= control target key start
LH: loop header
LB: loop body
LE: loop exit
PB: predicated region body
PF: predicated region fallthrough
CT: control target
= control target key end

     0   :  { %s28_s0 = inlined_call_operand.vmem [shape: f32[8], index: 0, kind: input, shape index: {}]   ;;  %s29_s1 = inlined_call_operand.vmem [shape: f32[16,8], index: 1, kind: output, shape index: {}]  }
   0x1   :  { %v4_v0 = vld [vmem:[%s28_s0] ss:$0 sm:$0xff] }
   0x2   :  { %5 = vst [vmem:[%s29_s1] sm:$0xff] %v4_v0  ;;  %8 = vst [vmem:[%s29_s1 + $0x8] sm:$0xff] %v4_v0 }

// kernel: tile.33
= control target key start
LH: loop header
LB: loop body
LE: loop exit
PB: predicated region body
PF: predicated region fallthrough
CT: control target
= control target key end

     0   :  { %s131_s10 = smov 120   ;;  %s132_s11 = smov 104   ;;  %vm3_vm0 = vcmask 64512   ;;  %vm9_vm1 = vcmask 1048512   ;;  %vm15_vm2 = vcmask 982912   ;;  %vm21_vm3 = vcmask 917312   ;;  %s207_s0 = inlined_call_operand.vmem [shape: f32[16,8], index: 0, kind: input, shape index: {}]   ;;  %s208_s1 = inlined_call_operand.vmem [shape: f32[1,128], index: 1, kind: output, shape index: {}]  }
   0x1   :  { %v101_v0 = vld [vmem:[%s207_s0 + $0xf] sm:$0x1]   ;;  %v103_v1 = vld [vmem:[%s207_s0 + $0xd] sm:$0x1]   ;;  %v102_v2 = vld [vmem:[%s207_s0 + $0xe] sm:$0x1]  }
   0x2   :  { %7 = vrot.lane.b32.xlu0 %v101_v0, %s131_s10  ;;  %19 = vrot.lane.b32.xlu1 %v103_v1, %s132_s11  ;;  %v104_v3 = vld [vmem:[%s207_s0 + $0xc] sm:$0x1]   ;;  %s133_s16 = smov 112   ;;  %s134_s17 = smov 96   ;;  %v105_v4 = vld [vmem:[%s207_s0 + $0xb] sm:$0x1]  }
   0x3   :  { %v106_v5 = vld [vmem:[%s207_s0 + $0xa] sm:$0x1]   ;;  %v2_v6 = vld [vmem:[%s207_s0] sm:$0x1]   ;;  %s135_s24 = smov 88   ;;  %s136_s25 = smov 80  }
   0x4   :  { %4 = vst.msk [vmem:[#allocation0] sm:$0x1] %vm3_vm0, %v2_v6   ;;  %v107_v7 = vld [vmem:[%s207_s0 + $0x9] sm:$0x1]   ;;  %v108_v8 = vld [vmem:[%s207_s0 + $0x8] sm:$0x1]  }
   0x5   :  { %s137_s30 = smov 72   ;;  %s138_s2 = smov 64   ;;  %v109_v9 = vld [vmem:[%s207_s0 + $0x7] sm:$0x1]   ;;  %v110_v10 = vld [vmem:[%s207_s0 + $0x6] sm:$0x1]  }
   0x6   :  { %13 = vrot.lane.b32.xlu0 %v102_v2, %s133_s16  ;;  %25 = vrot.lane.b32.xlu1 %v104_v3, %s134_s17  ;;  %s139_s7 = smov 56   ;;  %s140_s8 = smov 48   ;;  %v111_v11 = vld [vmem:[%s207_s0 + $0x5] sm:$0x1]   ;;  %v112_v12 = vld [vmem:[%s207_s0 + $0x4] sm:$0x1]  }
   0x7   :  { %s141_s13 = smov 40   ;;  %s142_s14 = smov 32   ;;  %v113_v13 = vld [vmem:[%s207_s0 + $0x3] sm:$0x1]   ;;  %v114_v14 = vld [vmem:[%s207_s0 + $0x2] sm:$0x1]  }
   0x8   :  { %s143_s19 = smov 24   ;;  %s144_s20 = smov 16   ;;  %v115_v15 = vld [vmem:[%s207_s0 + $0x1] sm:$0x1]   ;;  %vm27_vm4 = vcmask 851712   ;;  %vm33_vm5 = vcmask 786112  }
   0x9   :  { %s145_s0 = smov 8   ;;  %vm39_vm6 = vcmask 720512   ;;  %vm45_vm7 = vcmask 654912   ;;  %vm51_vm8 = vcmask 589312   ;;  %vm57_vm9 = vcmask 523712  }
   0xa   :  { %31 = vrot.lane.b32.xlu0 %v105_v4, %s135_s24  ;;  %37 = vrot.lane.b32.xlu1 %v106_v5, %s136_s25  ;;  %vm63_vm10 = vcmask 458112   ;;  %vm69_vm11 = vcmask 392512   ;;  %vm75_vm12 = vcmask 326912   ;;  %vm81_vm13 = vcmask 261312  }
   0xb   :  { %vm87_vm14 = vcmask 195712   ;;  %vm93_vm15 = vcmask 130112  }
   0xe   :  { %43 = vrot.lane.b32.xlu0 %v107_v7, %s137_s30  ;;  %49 = vrot.lane.b32.xlu1 %v108_v8, %s138_s2 }
  0x12   :  { %55 = vrot.lane.b32.xlu0 %v109_v9, %s139_s7  ;;  %61 = vrot.lane.b32.xlu1 %v110_v10, %s140_s8 }
  0x16   :  { %67 = vrot.lane.b32.xlu0 %v111_v11, %s141_s13  ;;  %73 = vrot.lane.b32.xlu1 %v112_v12, %s142_s14 }
  0x1a   :  { %79 = vrot.lane.b32.xlu0 %v113_v13, %s143_s19  ;;  %85 = vrot.lane.b32.xlu1 %v114_v14, %s144_s20 }
  0x1e   :  { %91 = vrot.lane.b32.xlu0 %v115_v15, %s145_s0 }
  0x74   :  { %v8_v16 = vpop.permute.xlu0 %7   ;;  %v20_v17 = vpop.permute.xlu1 %19  }
  0x75   :  { %10 = vst.msk [vmem:[#allocation0] sm:$0x1] %vm9_vm1, %v8_v16  }
  0x78   :  { %v14_v18 = vpop.permute.xlu0 %13   ;;  %v26_v19 = vpop.permute.xlu1 %25  }
  0x79   :  { %16 = vst.msk [vmem:[#allocation0] sm:$0x1] %vm15_vm2, %v14_v18  }
  0x7a   :  { %22 = vst.msk [vmem:[#allocation0] sm:$0x1] %vm21_vm3, %v20_v17  }
  0x7b   :  { %28 = vst.msk [vmem:[#allocation0] sm:$0x1] %vm27_vm4, %v26_v19  }
  0x7c   :  { %v32_v20 = vpop.permute.xlu0 %31   ;;  %v38_v21 = vpop.permute.xlu1 %37  }
  0x7d   :  { %34 = vst.msk [vmem:[#allocation0] sm:$0x1] %vm33_vm5, %v32_v20  }
  0x7e   :  { %40 = vst.msk [vmem:[#allocation0] sm:$0x1] %vm39_vm6, %v38_v21  }
  0x80   :  { %v44_v22 = vpop.permute.xlu0 %43   ;;  %v50_v23 = vpop.permute.xlu1 %49  }
  0x81   :  { %46 = vst.msk [vmem:[#allocation0] sm:$0x1] %vm45_vm7, %v44_v22  }
  0x82   :  { %52 = vst.msk [vmem:[#allocation0] sm:$0x1] %vm51_vm8, %v50_v23  }
  0x84   :  { %v56_v24 = vpop.permute.xlu0 %55   ;;  %v62_v25 = vpop.permute.xlu1 %61  }
  0x85   :  { %58 = vst.msk [vmem:[#allocation0] sm:$0x1] %vm57_vm9, %v56_v24  }
  0x86   :  { %64 = vst.msk [vmem:[#allocation0] sm:$0x1] %vm63_vm10, %v62_v25  }
  0x88   :  { %v68_v26 = vpop.permute.xlu0 %67   ;;  %v74_v27 = vpop.permute.xlu1 %73  }
  0x89   :  { %70 = vst.msk [vmem:[#allocation0] sm:$0x1] %vm69_vm11, %v68_v26  }
  0x8a   :  { %76 = vst.msk [vmem:[#allocation0] sm:$0x1] %vm75_vm12, %v74_v27  }
  0x8c   :  { %v80_v28 = vpop.permute.xlu0 %79   ;;  %v86_v29 = vpop.permute.xlu1 %85  }
  0x8d   :  { %82 = vst.msk [vmem:[#allocation0] sm:$0x1] %vm81_vm13, %v80_v28  }
  0x8e   :  { %88 = vst.msk [vmem:[#allocation0] sm:$0x1] %vm87_vm14, %v86_v29  }
  0x90   :  { %v92_v30 = vpop.permute.xlu0 %91  }
  0x91   :  { %94 = vst.msk [vmem:[#allocation0] sm:$0x1] %vm93_vm15, %v92_v30  }
  0x98   :  { %v98_v31 = vld [vmem:[#allocation0] sm:$0x1] }
  0x99   :  { %100 = vst [vmem:[%s208_s1] sm:$0x1] %v98_v31 }

// kernel: tile.44
= control target key start
LH: loop header
LB: loop body
LE: loop exit
PB: predicated region body
PF: predicated region fallthrough
CT: control target
= control target key end

     0   :  { %s28_s0 = inlined_call_operand.vmem [shape: f32[4], index: 0, kind: input, shape index: {}]   ;;  %s29_s1 = inlined_call_operand.vmem [shape: f32[16,4], index: 1, kind: output, shape index: {}]  }
   0x1   :  { %v4_v0 = vld [vmem:[%s28_s0] ss:$0 sm:$0xff] }
   0x2   :  { %5 = vst [vmem:[%s29_s1] sm:$0xff] %v4_v0  ;;  %8 = vst [vmem:[%s29_s1 + $0x8] sm:$0xff] %v4_v0 }

// kernel: tile.45
= control target key start
LH: loop header
LB: loop body
LE: loop exit
PB: predicated region body
PF: predicated region fallthrough
CT: control target
= control target key end

     0   :  { %s131_s10 = smov 60   ;;  %s132_s11 = smov 52   ;;  %vm3_vm0 = vcmask 31744   ;;  %vm9_vm1 = vcmask 523744   ;;  %vm15_vm2 = vcmask 490944   ;;  %vm21_vm3 = vcmask 458144   ;;  %s207_s0 = inlined_call_operand.vmem [shape: f32[16,4], index: 0, kind: input, shape index: {}]   ;;  %s208_s1 = inlined_call_operand.vmem [shape: f32[1,64], index: 1, kind: output, shape index: {}]  }
   0x1   :  { %v101_v0 = vld [vmem:[%s207_s0 + $0xf] sm:$0x1]   ;;  %v103_v1 = vld [vmem:[%s207_s0 + $0xd] sm:$0x1]   ;;  %v102_v2 = vld [vmem:[%s207_s0 + $0xe] sm:$0x1]  }
   0x2   :  { %7 = vrot.lane.b32.xlu0 %v101_v0, %s131_s10  ;;  %19 = vrot.lane.b32.xlu1 %v103_v1, %s132_s11  ;;  %v104_v3 = vld [vmem:[%s207_s0 + $0xc] sm:$0x1]   ;;  %s133_s16 = smov 56   ;;  %s134_s17 = smov 48   ;;  %v105_v4 = vld [vmem:[%s207_s0 + $0xb] sm:$0x1]  }
   0x3   :  { %v106_v5 = vld [vmem:[%s207_s0 + $0xa] sm:$0x1]   ;;  %v2_v6 = vld [vmem:[%s207_s0] sm:$0x1]   ;;  %s135_s24 = smov 44   ;;  %s136_s25 = smov 40  }
   0x4   :  { %4 = vst.msk [vmem:[#allocation0] sm:$0x1] %vm3_vm0, %v2_v6   ;;  %v107_v7 = vld [vmem:[%s207_s0 + $0x9] sm:$0x1]   ;;  %v108_v8 = vld [vmem:[%s207_s0 + $0x8] sm:$0x1]  }
   0x5   :  { %s137_s30 = smov 36   ;;  %s138_s2 = smov 32   ;;  %v109_v9 = vld [vmem:[%s207_s0 + $0x7] sm:$0x1]   ;;  %v110_v10 = vld [vmem:[%s207_s0 + $0x6] sm:$0x1]  }
   0x6   :  { %13 = vrot.lane.b32.xlu0 %v102_v2, %s133_s16  ;;  %25 = vrot.lane.b32.xlu1 %v104_v3, %s134_s17  ;;  %s139_s7 = smov 28   ;;  %s140_s8 = smov 24   ;;  %v111_v11 = vld [vmem:[%s207_s0 + $0x5] sm:$0x1]   ;;  %v112_v12 = vld [vmem:[%s207_s0 + $0x4] sm:$0x1]  }
   0x7   :  { %s141_s13 = smov 20   ;;  %s142_s14 = smov 16   ;;  %v113_v13 = vld [vmem:[%s207_s0 + $0x3] sm:$0x1]   ;;  %v114_v14 = vld [vmem:[%s207_s0 + $0x2] sm:$0x1]  }
   0x8   :  { %s143_s19 = smov 12   ;;  %s144_s20 = smov 8   ;;  %v115_v15 = vld [vmem:[%s207_s0 + $0x1] sm:$0x1]   ;;  %vm27_vm4 = vcmask 425344   ;;  %vm33_vm5 = vcmask 392544  }
   0x9   :  { %s145_s0 = smov 4   ;;  %vm39_vm6 = vcmask 359744   ;;  %vm45_vm7 = vcmask 326944   ;;  %vm51_vm8 = vcmask 294144   ;;  %vm57_vm9 = vcmask 261344  }
   0xa   :  { %31 = vrot.lane.b32.xlu0 %v105_v4, %s135_s24  ;;  %37 = vrot.lane.b32.xlu1 %v106_v5, %s136_s25  ;;  %vm63_vm10 = vcmask 228544   ;;  %vm69_vm11 = vcmask 195744   ;;  %vm75_vm12 = vcmask 162944   ;;  %vm81_vm13 = vcmask 130144  }
   0xb   :  { %vm87_vm14 = vcmask 97344   ;;  %vm93_vm15 = vcmask 64544  }
   0xe   :  { %43 = vrot.lane.b32.xlu0 %v107_v7, %s137_s30  ;;  %49 = vrot.lane.b32.xlu1 %v108_v8, %s138_s2 }
  0x12   :  { %55 = vrot.lane.b32.xlu0 %v109_v9, %s139_s7  ;;  %61 = vrot.lane.b32.xlu1 %v110_v10, %s140_s8 }
  0x16   :  { %67 = vrot.lane.b32.xlu0 %v111_v11, %s141_s13  ;;  %73 = vrot.lane.b32.xlu1 %v112_v12, %s142_s14 }
  0x1a   :  { %79 = vrot.lane.b32.xlu0 %v113_v13, %s143_s19  ;;  %85 = vrot.lane.b32.xlu1 %v114_v14, %s144_s20 }
  0x1e   :  { %91 = vrot.lane.b32.xlu0 %v115_v15, %s145_s0 }
  0x74   :  { %v8_v16 = vpop.permute.xlu0 %7   ;;  %v20_v17 = vpop.permute.xlu1 %19  }
  0x75   :  { %10 = vst.msk [vmem:[#allocation0] sm:$0x1] %vm9_vm1, %v8_v16  }
  0x78   :  { %v14_v18 = vpop.permute.xlu0 %13   ;;  %v26_v19 = vpop.permute.xlu1 %25  }
  0x79   :  { %16 = vst.msk [vmem:[#allocation0] sm:$0x1] %vm15_vm2, %v14_v18  }
  0x7a   :  { %22 = vst.msk [vmem:[#allocation0] sm:$0x1] %vm21_vm3, %v20_v17  }
  0x7b   :  { %28 = vst.msk [vmem:[#allocation0] sm:$0x1] %vm27_vm4, %v26_v19  }
  0x7c   :  { %v32_v20 = vpop.permute.xlu0 %31   ;;  %v38_v21 = vpop.permute.xlu1 %37  }
  0x7d   :  { %34 = vst.msk [vmem:[#allocation0] sm:$0x1] %vm33_vm5, %v32_v20  }
  0x7e   :  { %40 = vst.msk [vmem:[#allocation0] sm:$0x1] %vm39_vm6, %v38_v21  }
  0x80   :  { %v44_v22 = vpop.permute.xlu0 %43   ;;  %v50_v23 = vpop.permute.xlu1 %49  }
  0x81   :  { %46 = vst.msk [vmem:[#allocation0] sm:$0x1] %vm45_vm7, %v44_v22  }
  0x82   :  { %52 = vst.msk [vmem:[#allocation0] sm:$0x1] %vm51_vm8, %v50_v23  }
  0x84   :  { %v56_v24 = vpop.permute.xlu0 %55   ;;  %v62_v25 = vpop.permute.xlu1 %61  }
  0x85   :  { %58 = vst.msk [vmem:[#allocation0] sm:$0x1] %vm57_vm9, %v56_v24  }
  0x86   :  { %64 = vst.msk [vmem:[#allocation0] sm:$0x1] %vm63_vm10, %v62_v25  }
  0x88   :  { %v68_v26 = vpop.permute.xlu0 %67   ;;  %v74_v27 = vpop.permute.xlu1 %73  }
  0x89   :  { %70 = vst.msk [vmem:[#allocation0] sm:$0x1] %vm69_vm11, %v68_v26  }
  0x8a   :  { %76 = vst.msk [vmem:[#allocation0] sm:$0x1] %vm75_vm12, %v74_v27  }
  0x8c   :  { %v80_v28 = vpop.permute.xlu0 %79   ;;  %v86_v29 = vpop.permute.xlu1 %85  }
  0x8d   :  { %82 = vst.msk [vmem:[#allocation0] sm:$0x1] %vm81_vm13, %v80_v28  }
  0x8e   :  { %88 = vst.msk [vmem:[#allocation0] sm:$0x1] %vm87_vm14, %v86_v29  }
  0x90   :  { %v92_v30 = vpop.permute.xlu0 %91  }
  0x91   :  { %94 = vst.msk [vmem:[#allocation0] sm:$0x1] %vm93_vm15, %v92_v30  }
  0x98   :  { %v98_v31 = vld [vmem:[#allocation0] sm:$0x1] }
  0x99   :  { %100 = vst [vmem:[%s208_s1] sm:$0x1] %v98_v31 }

// kernel: _lambda_.1
= control target key start
LH: loop header
LB: loop body
LE: loop exit
PB: predicated region body
PF: predicated region fallthrough
CT: control target
= control target key end

     0   :  { %vm79_vm0 = vcmask 523264   ;;  %vm86_vm1 = vcmask 1046528   ;;  %vm98_vm2 = vcmask 522240   ;;  %v1219_v3 = vmov 0.0|0.0   ;;  %s1220_s27 = smov 64   ;;  %s1623_s0 = inlined_call_operand.vmem [shape: f32[2,16,64], index: 0, kind: input, shape index: {}]   ;;  %s1624_s1 = inlined_call_operand.vmem [shape: f32[192,128], index: 1, kind: input, shape index: {}]   ;;  %s1625_s3 = inlined_call_operand.vmem [shape: f32[128,8], index: 3, kind: input, shape index: {}]   ;;  %s1626_s8 = inlined_call_operand.vmem [shape: f32[128,64], index: 8, kind: input, shape index: {}]   ;;  %s1627_s4 = inlined_call_operand.vmem [shape: f32[8,4], index: 4, kind: input, shape index: {}]   ;;  %s1628_s2 = inlined_call_operand.vmem [shape: f32[1,128], index: 2, kind: input, shape index: {}]   ;;  %s1629_s6 = inlined_call_operand.vmem [shape: f32[4,128], index: 6, kind: input, shape index: {}]   ;;  %s1630_s5 = inlined_call_operand.vmem [shape: f32[1,4], index: 5, kind: input, shape index: {}]   ;;  %s1631_s9 = inlined_call_operand.vmem [shape: f32[1,64], index: 9, kind: input, shape index: {}]   ;;  %s1632_s10 = inlined_call_operand.vmem [shape: f32[64,128], index: 10, kind: input, shape index: {}]   ;;  %s1633_s7 = inlined_call_operand.vmem [shape: f32[1,128], index: 7, kind: input, shape index: {}]   ;;  %s1634_s11 = inlined_call_operand.vmem [shape: f32[1,128], index: 11, kind: input, shape index: {}]   ;;  %s1635_s12 = inlined_call_operand.vmem [shape: f32[2,16,128], index: 12, kind: output, shape index: {}]  }
   0x1   :  { %v1292_v0 = vld [vmem:[%s1623_s0] sm:$0xff]  ;;  %v42_v1 = vld [vmem:[%s1623_s0 + $0x8] sm:$0xff]  ;;  %v1300_v2 = vld [vmem:[%s1623_s0 + $0x10] sm:$0xff]  ;;  %1070 = vmatprep.subr.bf16.mxu0 %v1219_v3  ;;  %vm83_vm3 = vcmask 516096   ;;  %vm66_vm4 = vcmask 1040384   ;;  %v1221_v20 = vmov 0.0  }
   0x2   :  { %49 = vrot.lane.b32.xlu0 %v1292_v0, %s1220_s27  ;;  %v67_v4 = vrot.slane %v1292_v0, 7  ;;  %v87_v5 = vrot.slane %v1292_v0, 1  ;;  %v68_v6 = vrot.slane %v42_v1, 7  ;;  %v88_v7 = vrot.slane %v42_v1, 1  ;;  %53 = vrot.lane.b32.xlu1 %v1300_v2, %s1220_s27  ;;  %v44_v8 = vld [vmem:[%s1623_s0 + $0x18] sm:$0xff]  ;;  %v112_v9 = vld [vmem:[%s1624_s1] sm:$0xff] }
   0x3   :  { %v70_v10 = vrot.slane %v1300_v2, 7  ;;  %v90_v11 = vrot.slane %v1300_v2, 1  ;;  %v71_v12 = vrot.slane %v44_v8, 7  ;;  %v91_v13 = vrot.slane %v44_v8, 1  ;;  %v113_v14 = vld [vmem:[%s1624_s1 + $0x8] sm:$0xff]  ;;  %v114_v17 = vld [vmem:[%s1624_s1 + $0x10] sm:$0xff] }
   0x4   :  { %99 = vst.msk [vmem:[#allocation2 + $0x18] sm:$0x7f] %vm98_vm2, %v88_v7  ;;  %v89_v15 = vsel %vm86_vm1, %v87_v5, %v88_v7  ;;  %v1071_v16 = vpack.c.bf16 %v113_v14, %v112_v9  ;;  %v115_v18 = vld [vmem:[%s1624_s1 + $0x18] sm:$0xff]  ;;  %v1335_v21 = vsel %vm66_vm4, %v67_v4, %v68_v6  ;;  %v116_v24 = vld [vmem:[%s1624_s1 + $0x20] sm:$0xff]  ;;  %v117_v25 = vld [vmem:[%s1624_s1 + $0x28] sm:$0xff]  ;;  %vm61_vm5 = vcmask 1048064  }
   0x5   :  { %97 = vst.msk [vmem:[#allocation2 + $0x8] sm:$0xff] %vm79_vm0, %v89_v15  ;;  %v92_v19 = vsel %vm86_vm1, %v90_v11, %v91_v13  ;;  %v1340_v22 = vsel %vm66_vm4, %v70_v10, %v71_v12  ;;  %v1074_v23 = vpack.c.bf16 %v115_v18, %v114_v17  ;;  %v1077_v26 = vpack.c.bf16 %v117_v25, %v116_v24  ;;  %v244_v27 = vld [vmem:[%s1625_s3] sm:$0xff]  ;;  %v245_v28 = vld [vmem:[%s1625_s3 + $0x8] sm:$0xff]  ;;  %v118_v29 = vld [vmem:[%s1624_s1 + $0x30] sm:$0xff] }
   0x6   :  { %101 = vst.msk [vmem:[#allocation2 + $0x38] sm:$0x7f] %vm98_vm2, %v91_v13  ;;  %51 = vrot.lane.b32.xlu0 %v42_v1, %s1220_s27  ;;  %55 = vrot.lane.b32.xlu1 %v44_v8, %s1220_s27  ;;  %v119_v30 = vld [vmem:[%s1624_s1 + $0x38] sm:$0xff]  ;;  %v1106_v32 = vpack.c.bf16 %v245_v28, %v244_v27  ;;  %v246_v33 = vld [vmem:[%s1625_s3 + $0x10] sm:$0xff]  ;;  %vm77_vm6 = vcmask 523265   ;;  %vm1222_vm7 = vmmov 0  }
   0x7   :  { %102 = vst.msk [vmem:[#allocation2 + $0x1f] sm:$0x1] %vm83_vm3, %v1221_v20  ;;  %103 = vst.msk [vmem:[#allocation2 + $0x3f] sm:$0x1] %vm83_vm3, %v1221_v20  ;;  %1072 = vmatpush1.bf16.msra.mxu0 %v1071_v16  ;;  %v247_v34 = vld [vmem:[%s1625_s3 + $0x18] sm:$0xff]  ;;  %v248_v36 = vld [vmem:[%s1625_s3 + $0x20] sm:$0xff]  ;;  %v1080_v38 = vpack.c.bf16 %v119_v30, %v118_v29 }
   0x8   :  { %100 = vst.msk [vmem:[#allocation2 + $0x28] sm:$0xff] %vm79_vm0, %v92_v19  ;;  %1073 = vmatprep.subr.bf16.mxu0 %v1219_v3  ;;  %1107 = vmatprep.subr.bf16.mxu1 %v1106_v32  ;;  %v1110_v35 = vpack.c.bf16 %v247_v34, %v246_v33  ;;  %v249_v37 = vld [vmem:[%s1625_s3 + $0x28] sm:$0xff]  ;;  %v120_v39 = vld [vmem:[%s1624_s1 + $0x40] sm:$0xff]  ;;  %v250_v42 = vld [vmem:[%s1625_s3 + $0x30] sm:$0xff]  ;;  %vm654_vm8 = vcmask 1041409   ;;  %vm369_vm9 = vcmask 64512  }
   0x9   :  { %1109 = vmatpush3.bf16.msra.mxu1 %v1106_v32  ;;  %v121_v40 = vld [vmem:[%s1624_s1 + $0x48] sm:$0xff]  ;;  %v1114_v41 = vpack.c.bf16 %v249_v37, %v248_v36  ;;  %v251_v43 = vld [vmem:[%s1625_s3 + $0x38] sm:$0xff]  ;;  %v122_v45 = vld [vmem:[%s1624_s1 + $0x50] sm:$0xff]  ;;  %vm516_vm10 = vcmask 1043456   ;;  %vm503_vm11 = vcmask 31744  }
   0xa   :  { %1111 = vmatprep.subr.bf16.mxu1 %v1110_v35  ;;  %v1083_v44 = vpack.c.bf16 %v121_v40, %v120_v39  ;;  %v123_v46 = vld [vmem:[%s1624_s1 + $0x58] sm:$0xff]  ;;  %v1118_v47 = vpack.c.bf16 %v251_v43, %v250_v42  ;;  %v252_v48 = vld [vmem:[%s1625_s3 + $0x40] sm:$0xff]  ;;  %v253_v49 = vld [vmem:[%s1625_s3 + $0x48] sm:$0xff] }
   0xb   :  { %1075 = vmatpush1.bf16.msra.mxu0 %v1074_v23  ;;  %v1086_v50 = vpack.c.bf16 %v123_v46, %v122_v45  ;;  %v124_v51 = vld [vmem:[%s1624_s1 + $0x60] sm:$0xff]  ;;  %v125_v52 = vld [vmem:[%s1624_s1 + $0x68] sm:$0xff]  ;;  %v1122_v53 = vpack.c.bf16 %v253_v49, %v252_v48  ;;  %v254_v54 = vld [vmem:[%s1625_s3 + $0x50] sm:$0xff] }
   0xc   :  { %1076 = vmatprep.subr.bf16.mxu0 %v1219_v3  ;;  %v105_v31 = vld [vmem:[#allocation2 + $0x8] sm:$0xff]  ;;  %v255_v55 = vld [vmem:[%s1625_s3 + $0x58] sm:$0xff]  ;;  %v1089_v56 = vpack.c.bf16 %v125_v52, %v124_v51  ;;  %v126_v57 = vld [vmem:[%s1624_s1 + $0x70] sm:$0xff] }
   0xd   :  { %878 = vmatprep.mubr.msk.f32.mxu0 %vm79_vm0, %v105_v31  ;;  %1113 = vmatpush3.bf16.msra.mxu1 %v1110_v35  ;;  %v127_v58 = vld [vmem:[%s1624_s1 + $0x78] sm:$0xff]  ;;  %v1126_v59 = vpack.c.bf16 %v255_v55, %v254_v54  ;;  %v128_v61 = vld [vmem:[%s1624_s1 + $0x80] sm:$0xff]  ;;  %v129_v62 = vld [vmem:[%s1624_s1 + $0x88] sm:$0xff] }
   0xe   :  { %1115 = vmatprep.subr.bf16.mxu1 %v1114_v41  ;;  %v1092_v60 = vpack.c.bf16 %v127_v58, %v126_v57  ;;  %v1095_v63 = vpack.c.bf16 %v129_v62, %v128_v61  ;;  %v130_v1 = vld [vmem:[%s1624_s1 + $0x90] sm:$0xff]  ;;  %v131_v5 = vld [vmem:[%s1624_s1 + $0x98] sm:$0xff]  ;;  %v132_v7 = vld [vmem:[%s1624_s1 + $0xa0] sm:$0xff] }
   0xf   :  { %1078 = vmatpush1.bf16.msra.mxu0 %v1077_v26  ;;  %v1098_v6 = vpack.c.bf16 %v131_v5, %v130_v1  ;;  %v133_v8 = vld [vmem:[%s1624_s1 + $0xa8] sm:$0xff]  ;;  %v134_v11 = vld [vmem:[%s1624_s1 + $0xb0] sm:$0xff]  ;;  %v135_v12 = vld [vmem:[%s1624_s1 + $0xb8] sm:$0xff] }
  0x10   :  { %1079 = vmatprep.subr.bf16.mxu0 %v1219_v3  ;;  %v1101_v9 = vpack.c.bf16 %v133_v8, %v132_v7  ;;  %v1104_v13 = vpack.c.bf16 %v135_v12, %v134_v11  ;;  %v107_v0 = vld [vmem:[#allocation2 + $0x18] sm:$0xff]  ;;  %v109_v2 = vld [vmem:[#allocation2 + $0x28] sm:$0xff]  ;;  %v629_v25 = vld [vmem:[%s1626_s8] sm:$0xff] }
  0x11   :  { %1117 = vmatpush3.bf16.msra.mxu1 %v1114_v41  ;;  %v111_v19 = vld [vmem:[#allocation2 + $0x38] sm:$0xff]  ;;  %v630_v26 = vld [vmem:[%s1626_s8 + $0x8] sm:$0xff]  ;;  %v258_v28 = vld [vmem:[%s1625_s3 + $0x70] sm:$0xff] }
  0x12   :  { %1119 = vmatprep.subr.bf16.mxu1 %v1118_v47  ;;  %v1139_v27 = vpack.c.bf16 %v630_v26, %v629_v25  ;;  %v259_v29 = vld [vmem:[%s1625_s3 + $0x78] sm:$0xff]  ;;  %v631_v31 = vld [vmem:[%s1626_s8 + $0x10] sm:$0xff]  ;;  %v633_v34 = vld [vmem:[%s1626_s8 + $0x20] sm:$0xff] }
  0x13   :  { %1081 = vmatpush1.bf16.msra.mxu0 %v1080_v38  ;;  %v1134_v30 = vpack.c.bf16 %v259_v29, %v258_v28  ;;  %v632_v32 = vld [vmem:[%s1626_s8 + $0x18] sm:$0xff]  ;;  %v634_v35 = vld [vmem:[%s1626_s8 + $0x28] sm:$0xff]  ;;  %v635_v37 = vld [vmem:[%s1626_s8 + $0x30] sm:$0xff] }
  0x14   :  { %1082 = vmatprep.subr.bf16.mxu0 %v1219_v3  ;;  %v1142_v33 = vpack.c.bf16 %v632_v32, %v631_v31  ;;  %v1145_v36 = vpack.c.bf16 %v634_v35, %v633_v34  ;;  %v636_v38 = vld [vmem:[%s1626_s8 + $0x38] sm:$0xff]  ;;  %v637_v40 = vld [vmem:[%s1626_s8 + $0x40] sm:$0xff]  ;;  %v638_v41 = vld [vmem:[%s1626_s8 + $0x48] sm:$0xff] }
  0x15   :  { %1121 = vmatpush3.bf16.msra.mxu1 %v1118_v47  ;;  %v1148_v39 = vpack.c.bf16 %v636_v38, %v635_v37  ;;  %v1151_v42 = vpack.c.bf16 %v638_v41, %v637_v40  ;;  %v639_v43 = vld [vmem:[%s1626_s8 + $0x50] sm:$0xff]  ;;  %v641_v46 = vld [vmem:[%s1626_s8 + $0x60] sm:$0xff]  ;;  %v642_v47 = vld [vmem:[%s1626_s8 + $0x68] sm:$0xff] }
  0x16   :  { %1123 = vmatprep.subr.bf16.mxu1 %v1122_v53  ;;  %v1157_v48 = vpack.c.bf16 %v642_v47, %v641_v46  ;;  %v643_v49 = vld [vmem:[%s1626_s8 + $0x70] sm:$0xff]  ;;  %v361_v52 = vld [vmem:[%s1627_s4] sm:$0xff] }
  0x17   :  { %1084 = vmatpush1.bf16.msra.mxu0 %v1083_v44  ;;  %v640_v44 = vld [vmem:[%s1626_s8 + $0x58] sm:$0xff]  ;;  %v495_v31 = vld [vmem:[%s1629_s6] sm:$0xf] }
  0x18   :  { %1085 = vmatprep.subr.bf16.mxu0 %v1219_v3  ;;  %v1154_v45 = vpack.c.bf16 %v640_v44, %v639_v43  ;;  %v882_v32 = vld [vmem:[%s1630_s5] ss:$0 sm:$0xff] }
  0x19   :  { %1125 = vmatpush3.bf16.msra.mxu1 %v1122_v53  ;;  %v877_v53 = vld [vmem:[%s1628_s2] ss:$0 sm:$0xff] }
  0x1a   :  { %1127 = vmatprep.subr.bf16.mxu1 %v1126_v59 }
  0x1b   :  { %1087 = vmatpush1.bf16.msra.mxu0 %v1086_v50  ;;  %v644_v50 = vld [vmem:[%s1626_s8 + $0x78] sm:$0xff] }
  0x1c   :  { %1088 = vmatprep.subr.bf16.mxu0 %v1219_v3  ;;  %v1160_v51 = vpack.c.bf16 %v644_v50, %v643_v49 }
  0x1d   :  { %1129 = vmatpush3.bf16.msra.mxu1 %v1126_v59 }
  0x1f   :  { %1090 = vmatpush1.bf16.msra.mxu0 %v1089_v56 }
  0x20   :  { %1091 = vmatprep.subr.bf16.mxu0 %v1219_v3 }
  0x23   :  { %1093 = vmatpush1.bf16.msra.mxu0 %v1092_v60 }
  0x24   :  { %1094 = vmatprep.subr.bf16.mxu0 %v1219_v3 }
  0x27   :  { %1096 = vmatpush1.bf16.msra.mxu0 %v1095_v63 }
  0x28   :  { %1097 = vmatprep.subr.bf16.mxu0 %v1219_v3 }
  0x2b   :  { %1099 = vmatpush1.bf16.msra.mxu0 %v1098_v6 }
  0x2c   :  { %1100 = vmatprep.subr.bf16.mxu0 %v1219_v3 }
  0x2f   :  { %1102 = vmatpush1.bf16.msra.mxu0 %v1101_v9 }
  0x30   :  { %1103 = vmatprep.subr.bf16.mxu0 %v1219_v3 }
  0x33   :  { %1105 = vmatpush1.bf16.msra.mxu0 %v1104_v13 }
  0x34   :  { %1138 = vmatprep.subr.bf16.mxu0 %v1219_v3 }
  0x74   :  { %v50_v14 = vpop.permute.xlu0 %49  ;;  %v54_v15 = vpop.permute.xlu1 %53 }
  0x75   :  { %62 = vst.msk [vmem:[#allocation2] sm:$0xff] %vm61_vm5, %v50_v14  ;;  %64 = vst.msk [vmem:[#allocation2 + $0x20] sm:$0xff] %vm61_vm5, %v54_v15 }
  0x76   :  { %78 = vst.msk [vmem:[#allocation2] sm:$0xfe] %vm77_vm6, %v67_v4  ;;  %81 = vst.msk [vmem:[#allocation2 + $0x20] sm:$0xfe] %vm77_vm6, %v70_v10 }
  0x77   :  { %84 = vst.msk [vmem:[#allocation2] sm:$0x1] %vm83_vm3, %v1221_v20  ;;  %85 = vst.msk [vmem:[#allocation2 + $0x20] sm:$0x1] %vm83_vm3, %v1221_v20 }
  0x78   :  { %v52_v16 = vpop.permute.xlu0 %51  ;;  %v56_v17 = vpop.permute.xlu1 %55 }
  0x79   :  { %63 = vst.msk [vmem:[#allocation2 + $0x10] sm:$0xff] %vm61_vm5, %v52_v16  ;;  %65 = vst.msk [vmem:[#allocation2 + $0x30] sm:$0xff] %vm61_vm5, %v56_v17 }
  0x7a   :  { %80 = vst.msk [vmem:[#allocation2 + $0x10] sm:$0xff] %vm79_vm0, %v1335_v21  ;;  %82 = vst.msk [vmem:[#allocation2 + $0x30] sm:$0xff] %vm79_vm0, %v1340_v22  ;;  %v256_v21 = vld [vmem:[%s1625_s3 + $0x60] sm:$0xff]  ;;  %v257_v22 = vld [vmem:[%s1625_s3 + $0x68] sm:$0xff] }
  0x7b   :  { %v1130_v24 = vpack.c.bf16 %v257_v22, %v256_v21 }
  0x7d   :  { %1131 = vmatprep.subr.bf16.mxu1 %v1130_v24 }
  0x7e   :  { %v104_v4 = vld [vmem:[#allocation2] sm:$0xff]  ;;  %1133 = vmatpush3.bf16.msra.mxu1 %v1130_v24 }
  0x7f   :  { %220 = vmatmul.mubr.f32.vlgmr.msra.gmra.mrb[0].mxu0 %v104_v4  ;;  %v108_v18 = vld [vmem:[#allocation2 + $0x20] sm:$0xff]  ;;  %1135 = vmatprep.subr.bf16.mxu1 %v1134_v30 }
  0x80   :  { %879 = vmatprep.mubr.msk.f32.mxu0 %vm79_vm0, %v107_v0  ;;  %1140 = vmatpush3.bf16.msra.mxu0 %v1139_v27 }
  0x81   :  { %v106_v10 = vld [vmem:[#allocation2 + $0x10] sm:$0xff]  ;;  %1141 = vmatprep.subr.bf16.mxu0 %v1219_v3 }
  0x82   :  { %v110_v23 = vld [vmem:[#allocation2 + $0x30] sm:$0xff]  ;;  %1137 = vmatpush3.bf16.msra.mxu1 %v1134_v30 }
  0x83   :  { %225 = vmatmul.mubr.f32.gmra.mrb[2].mxu0 %v106_v10  ;;  %1000 = vmatprep.subr.mxu1 %v361_v52 }
  0x84   :  { %880 = vmatprep.mubr.msk.f32.mxu0 %vm79_vm0, %v109_v2  ;;  %1143 = vmatpush3.bf16.msra.mxu0 %v1142_v33 }
  0x85   :  { %1144 = vmatprep.subr.bf16.mxu0 %v1219_v3 }
  0x87   :  { %230 = vmatmul.mubr.f32.gmra.mrb[4].mxu0 %v108_v18 }
  0x88   :  { %881 = vmatprep.mubr.msk.f32.mxu0 %vm79_vm0, %v111_v19  ;;  %1146 = vmatpush3.bf16.msra.mxu0 %v1145_v36 }
  0x89   :  { %1147 = vmatprep.subr.bf16.mxu0 %v1219_v3 }
  0x8b   :  { %235 = vmatmul.mubr.f32.gmra.mrb[6].mxu0 %v110_v23 }
  0x8c   :  { %1149 = vmatpush3.bf16.msra.mxu0 %v1148_v39  ;;  %1048 = vmatprep.mubr.msk.f32.mxu0 %vm1222_vm7, %v1221_v20  ;;  %v901_v39 = vld [vmem:[%s1631_s9] ss:$0 sm:$0xff] }
  0x8d   :  { %1150 = vmatprep.subr.bf16.mxu0 %v1219_v3 }
  0x90   :  { %1152 = vmatpush3.bf16.msra.mxu0 %v1151_v42 }
  0x91   :  { %1153 = vmatprep.subr.bf16.mxu0 %v1219_v3 }
  0x94   :  { %1155 = vmatpush3.bf16.msra.mxu0 %v1154_v45 }
  0x95   :  { %1156 = vmatprep.subr.bf16.mxu0 %v1219_v3 }
  0x98   :  { %1158 = vmatpush3.bf16.msra.mxu0 %v1157_v48 }
  0x99   :  { %1159 = vmatprep.subr.bf16.mxu0 %v1219_v3 }
  0x9c   :  { %1161 = vmatpush3.bf16.msra.mxu0 %v1160_v51 }
 0x152   :  { %v221_v54 = vpop.f32.mrb[0].mxu0 }
 0x153   :  { %v222_v55 = vadd.f32 %v877_v53, %v221_v54  ;;  %v223_v56 = vpop.f32.mrb[1].mxu0 }
 0x155   :  { %v1541_v57 = vmax.f32 %v222_v55, 0.0 }
 0x156   :  { %v226_v58 = vpop.f32.mrb[2].mxu0 }
 0x157   :  { %v227_v59 = vadd.f32 %v877_v53, %v226_v58  ;;  %v228_v60 = vpop.f32.mrb[3].mxu0  ;;  %994 = vmatprep.mubr.f32.mxu1 %v1541_v57  ;;  %v734_v58 = vld [vmem:[%s1632_s10] sm:$0xff] }
 0x159   :  { %v1544_v61 = vmax.f32 %v227_v59, 0.0  ;;  %v735_v59 = vld [vmem:[%s1632_s10 + $0x8] sm:$0xff] }
 0x15a   :  { %v231_v62 = vpop.f32.mrb[4].mxu0 }
 0x15b   :  { %v345_v63 = vadd.f32 %v1544_v61, %v1541_v57  ;;  %995 = vmatmul.mubr.f32.vlgmr.msra.gmra.mrb[0].mxu1 %v1544_v61  ;;  %v232_v1 = vadd.f32 %v877_v53, %v231_v62  ;;  %v233_v5 = vpop.f32.mrb[5].mxu0 }
 0x15c   :  { %1001 = vmatpush3.msra.mxu1 %v361_v52  ;;  %v1163_v5 = vpack.c.bf16 %v735_v59, %v734_v58 }
 0x15d   :  { %v346_v6 = vrot.slane %v345_v63, 4  ;;  %v1549_v7 = vmax.f32 %v232_v1, 0.0  ;;  %1008 = vmatprep.subr.msk.mxu1 %vm516_vm10, %v495_v31 }
 0x15e   :  { %v236_v8 = vpop.f32.mrb[6].mxu0 }
 0x15f   :  { %v347_v9 = vadd.f32 %v346_v6, %v345_v63  ;;  %v237_v11 = vadd.f32 %v877_v53, %v236_v8  ;;  %v238_v12 = vpop.f32.mrb[7].mxu0  ;;  %997 = vmatprep.mubr.f32.mxu1 %v1549_v7  ;;  %v736_v8 = vld [vmem:[%s1632_s10 + $0x10] sm:$0xff] }
 0x160   :  { %v738_v12 = vld [vmem:[%s1632_s10 + $0x20] sm:$0xff] }
 0x161   :  { %v348_v13 = vrot.slane %v347_v9, 2  ;;  %v1552_v14 = vmax.f32 %v237_v11, 0.0 }
 0x163   :  { %v352_v15 = vadd.f32 %v1552_v14, %v1549_v7  ;;  %998 = vmatmul.mubr.f32.gmra.mrb[2].mxu1 %v1552_v14  ;;  %v349_v16 = vadd.f32 %v348_v13, %v347_v9  ;;  %v737_v9 = vld [vmem:[%s1632_s10 + $0x18] sm:$0xff]  ;;  %v739_v13 = vld [vmem:[%s1632_s10 + $0x28] sm:$0xff] }
 0x164   :  { %v1166_v11 = vpack.c.bf16 %v737_v9, %v736_v8 }
 0x165   :  { %v353_v17 = vrot.slane %v352_v15, 4  ;;  %v350_v4 = vrot.slane %v349_v16, 1 }
 0x167   :  { %v354_v0 = vadd.f32 %v353_v17, %v352_v15  ;;  %v351_v19 = vadd.f32 %v350_v4, %v349_v16 }
 0x169   :  { %v355_v2 = vrot.slane %v354_v0, 2  ;;  %v359_v21 = vmul.f32 0.0625, %v351_v19 }
 0x16b   :  { %v356_v10 = vadd.f32 %v355_v2, %v354_v0  ;;  %v1169_v0 = vpack.c.bf16 %v739_v13, %v738_v12  ;;  %v740_v2 = vld [vmem:[%s1632_s10 + $0x30] sm:$0xff] }
 0x16d   :  { %v357_v18 = vrot.slane %v356_v10, 1 }
 0x16f   :  { %v358_v23 = vadd.f32 %v357_v18, %v356_v10  ;;  %v741_v10 = vld [vmem:[%s1632_s10 + $0x38] sm:$0xff] }
 0x170   :  { %v1172_v18 = vpack.c.bf16 %v741_v10, %v740_v2 }
 0x171   :  { %v360_v22 = vmul.f32 0.0625, %v358_v23 }
 0x173   :  { %v655_v24 = vsel %vm654_vm8, %v360_v22, %v359_v21 }
 0x174   :  { %1049 = vmatmul.mubr.f32.vlgmr.msra.gmra.mrb[8].mxu0 %v655_v24  ;;  %v891_v24 = vld [vmem:[%s1633_s7] ss:$0 sm:$0xff] }
 0x22e   :  { %v996_v25 = vpop.f32.mrb[0].mxu1 }
 0x22f   :  { %v326_v26 = vpop.f32.mrb[1].mxu1 }
 0x230   :  { %1002 = vmatprep.mubr.msk.f32.mxu1 %vm369_vm9, %v326_v26 }
 0x231   :  { %1003 = vmatmul.mubr.msk.f32.vlgmr.msra.gmra.mrb[4].mxu1 %vm369_vm9, %v996_v25 }
 0x232   :  { %1009 = vmatpush3.msk.msra.mxu1 %vm516_vm10, %v495_v31 }
 0x233   :  { %1162 = vmatprep.subr.bf16.mxu1 %v1219_v3 }
 0x236   :  { %v999_v27 = vpop.f32.mrb[2].mxu1 }
 0x237   :  { %v336_v28 = vpop.f32.mrb[3].mxu1 }
 0x238   :  { %1005 = vmatprep.mubr.msk.f32.mxu1 %vm369_vm9, %v336_v28 }
 0x239   :  { %1006 = vmatmul.mubr.msk.f32.gmra.mrb[6].mxu1 %vm369_vm9, %v999_v27 }
 0x247   :  { %v723_v29 = vpop.f32.mrb[8].mxu0 }
 0x248   :  { %v1050_v30 = vpop.f32.mrb[9].mxu0  ;;  %v724_v41 = vadd.f32 %v901_v39, %v723_v29 }
 0x24a   :  { %v902_v47 = vmul.f32 -1.442695, %v724_v41 }
 0x304   :  { %v1004_v33 = vpop.f32.mrb[4].mxu1 }
 0x305   :  { %v454_v34 = vadd.f32 %v1004_v33, %v882_v32  ;;  %v448_v35 = vpop.f32.mrb[5].mxu1 }
 0x306   :  { %v449_v36 = vadd.f32 %v882_v32, %v448_v35 }
 0x307   :  { %v888_v37 = vmul.f32 -1.442695, %v454_v34 }
 0x308   :  { %v887_v38 = vmul.f32 -1.442695, %v449_v36 }
 0x309   :  { %1179 = vpow2.f32 %v888_v37 }
 0x30a   :  { %1181 = vpow2.f32 %v887_v38 }
 0x30c   :  { %v1007_v40 = vpop.f32.mrb[6].mxu1 }
 0x30d   :  { %v464_v42 = vadd.f32 %v1007_v40, %v882_v32  ;;  %v458_v43 = vpop.f32.mrb[7].mxu1 }
 0x30e   :  { %v459_v44 = vadd.f32 %v882_v32, %v458_v43 }
 0x30f   :  { %v890_v45 = vmul.f32 -1.442695, %v464_v42 }
 0x310   :  { %v889_v46 = vmul.f32 -1.442695, %v459_v44 }
 0x311   :  { %1183 = vpow2.f32 %v890_v45 }
 0x312   :  { %1185 = vpow2.f32 %v889_v46 }
 0x313   :  { %v1180_v48 = vpop.eup %1179  ;;  %1187 = vpow2.f32 %v902_v47  ;;  %v1223_v47 = vmov 1966171168  }
 0x314   :  { %v1182_v49 = vpop.eup %1181  ;;  %v480_v50 = vadd.f32 1.0, %v1180_v48  ;;  %v834_v48 = vunpack.c.l.s4 %v1223_v47 }
 0x315   :  { %v479_v51 = vadd.f32 1.0, %v1182_v49  ;;  %v836_v49 = vlaneseq }
 0x316   :  { %1189 = vrcp.f32 %v480_v50 }
 0x317   :  { %1191 = vrcp.f32 %v479_v51  ;;  %v835_v51 = vunpack.c.0.s8 %v834_v48 }
 0x31b   :  { %v1184_v52 = vpop.eup %1183 }
 0x31c   :  { %v1186_v53 = vpop.eup %1185  ;;  %v482_v54 = vadd.f32 1.0, %v1184_v52  ;;  %v837_v52 = vshrl.u32 %v836_v49, 7 }
 0x31d   :  { %v481_v55 = vadd.f32 1.0, %v1186_v53  ;;  %v1188_v56 = vpop.eup %1187 }
 0x31e   :  { %1193 = vrcp.f32 %v482_v54  ;;  %v730_v63 = vadd.f32 1.0, %v1188_v56  ;;  %v838_v53 = vsub.s32 %v835_v51, %v837_v52  ;;  %v857_v58 = vsub.s32 0, %v837_v52 }
 0x31f   :  { %1195 = vrcp.f32 %v481_v55 }
 0x320   :  { %v1190_v60 = vpop.eup %1189  ;;  %1197 = vrcp.f32 %v730_v63 }
 0x321   :  { %v1192_v62 = vpop.eup %1191  ;;  %v492_v6 = vmul.f32 %v1190_v60, %v454_v34 }
 0x322   :  { %v491_v1 = vmul.f32 %v1192_v62, %v449_v36 }
 0x324   :  { %1010 = vmatprep.mubr.msk.f32.mxu1 %vm503_vm11, %v491_v1 }
 0x325   :  { %1011 = vmatmul.mubr.msk.f32.vlgmr.msra.gmra.mrb[8].mxu1 %vm503_vm11, %v492_v6 }
 0x326   :  { %1164 = vmatpush3.bf16.msra.mxu1 %v1163_v5 }
 0x327   :  { %1165 = vmatprep.subr.bf16.mxu1 %v1219_v3 }
 0x328   :  { %v1194_v15 = vpop.eup %1193 }
 0x329   :  { %v1196_v16 = vpop.eup %1195  ;;  %v494_v4 = vmul.f32 %v1194_v15, %v464_v42 }
 0x32a   :  { %v493_v17 = vmul.f32 %v1196_v16, %v459_v44  ;;  %1167 = vmatpush3.bf16.msra.mxu1 %v1166_v11  ;;  %v1198_v19 = vpop.eup %1197 }
 0x32b   :  { %1168 = vmatprep.subr.bf16.mxu1 %v1219_v3  ;;  %v733_v23 = vmul.f32 %v1198_v19, %v724_v41 }
 0x32c   :  { %1013 = vmatprep.mubr.msk.f32.mxu1 %vm503_vm11, %v493_v17 }
 0x32d   :  { %1014 = vmatmul.mubr.msk.f32.gmra.mrb[10].mxu1 %vm503_vm11, %v494_v4 }
 0x32e   :  { %1170 = vmatpush3.bf16.msra.mxu1 %v1169_v0  ;;  %1067 = vmatprep.mubr.msk.f32.mxu1 %vm1222_vm7, %v1221_v20 }
 0x32f   :  { %1171 = vmatprep.subr.bf16.mxu1 %v1219_v3  ;;  %v903_v3 = vld [vmem:[%s1634_s11] ss:$0 sm:$0xff] }
 0x332   :  { %1173 = vmatpush3.bf16.msra.mxu1 %v1172_v18 }
 0x335   :  { %1068 = vmatmul.mubr.msk.f32.vlgmr.msra.gmra.mrb[12].mxu1 %vm79_vm0, %v733_v23 }
 0x3f8   :  { %v1012_v21 = vpop.f32.mrb[8].mxu1 }
 0x3f9   :  { %v586_v22 = vpop.f32.mrb[9].mxu1  ;;  %v592_v26 = vadd.f32 %v1012_v21, %v891_v24 }
 0x3fa   :  { %v587_v28 = vadd.f32 %v891_v24, %v586_v22 }
 0x3fb   :  { %v898_v20 = vmul.f32 -1.442695, %v592_v26 }
 0x3fc   :  { %v897_v31 = vmul.f32 -1.442695, %v587_v28 }
 0x3fd   :  { %1199 = vpow2.f32 %v898_v20 }
 0x3fe   :  { %1201 = vpow2.f32 %v897_v31 }
 0x400   :  { %v1015_v25 = vpop.f32.mrb[10].mxu1 }
 0x401   :  { %v596_v27 = vpop.f32.mrb[11].mxu1  ;;  %v602_v29 = vadd.f32 %v1015_v25, %v891_v24 }
 0x402   :  { %v597_v30 = vadd.f32 %v891_v24, %v596_v27 }
 0x403   :  { %v900_v32 = vmul.f32 -1.442695, %v602_v29 }
 0x404   :  { %v899_v33 = vmul.f32 -1.442695, %v597_v30 }
 0x405   :  { %1203 = vpow2.f32 %v900_v32 }
 0x406   :  { %1205 = vpow2.f32 %v899_v33 }
 0x407   :  { %v1200_v38 = vpop.eup %1199 }
 0x408   :  { %v818_v34 = vpop.f32.mrb[12].mxu1  ;;  %v1202_v39 = vpop.eup %1201  ;;  %v618_v43 = vadd.f32 1.0, %v1200_v38 }
 0x409   :  { %v819_v35 = vadd.f32 %v903_v3, %v818_v34  ;;  %v1069_v36 = vpop.f32.mrb[13].mxu1  ;;  %v617_v44 = vadd.f32 1.0, %v1202_v39 }
 0x40b   :  { %v905_v37 = vmul.f32 -1.442695, %v819_v35 }
 0x40d   :  { %1207 = vpow2.f32 %v905_v37 }
 0x40f   :  { %v1204_v40 = vpop.eup %1203 }
 0x410   :  { %v1206_v41 = vpop.eup %1205  ;;  %v620_v46 = vadd.f32 1.0, %v1204_v40 }
 0x411   :  { %v619_v50 = vadd.f32 1.0, %v1206_v41 }
 0x417   :  { %v1208_v42 = vpop.eup %1207 }
 0x418   :  { %v825_v45 = vadd.f32 1.0, %v1208_v42 }
 0x41a   :  { %1209 = vrcp.f32 %v825_v45 }
 0x41b   :  { %1211 = vrcp.f32 %v618_v43 }
 0x41c   :  { %1213 = vrcp.f32 %v617_v44 }
 0x41d   :  { %1215 = vrcp.f32 %v620_v46 }
 0x41e   :  { %1217 = vrcp.f32 %v619_v50 }
 0x424   :  { %v1210_v54 = vpop.eup %1209 }
 0x425   :  { %v1212_v55 = vpop.eup %1211  ;;  %v839_v56 = vrot.slane %v1210_v54, %v838_v53 }
 0x426   :  { %v1214_v59 = vpop.eup %1213  ;;  %v829_v5 = vmul.f32 %v1212_v55, %v1544_v61 }
 0x427   :  { %v1216_v60 = vpop.eup %1215  ;;  %v840_v62 = vcombine.high %v839_v56, %v839_v56  ;;  %v847_v63 = vrot.slane %v839_v56, %v838_v53  ;;  %v828_v6 = vmul.f32 %v1214_v59, %v1541_v57 }
 0x428   :  { %v1218_v1 = vpop.eup %1217  ;;  %v831_v11 = vmul.f32 %v1216_v60, %v1552_v14 }
 0x429   :  { %v854_v8 = vrot.slane %v840_v62, %v838_v53  ;;  %v858_v9 = vrot.slane %v847_v63, %v857_v58  ;;  %v830_v12 = vmul.f32 %v1218_v1, %v1549_v7 }
 0x42b   :  { %v862_v13 = vrot.slane %v854_v8, %v857_v58  ;;  %v865_v15 = vmul.f32 %v858_v9, %v828_v6  ;;  %v866_v16 = vmul.f32 %v858_v9, %v829_v5 }
 0x42d   :  { %v867_v17 = vmul.f32 %v862_v13, %v830_v12  ;;  %v868_v0 = vmul.f32 %v862_v13, %v831_v11  ;;  %869 = vst [vmem:[%s1635_s12] sm:$0xff] %v865_v15  ;;  %870 = vst [vmem:[%s1635_s12 + $0x8] sm:$0xff] %v866_v16 }
 0x42f   :  { %871 = vst [vmem:[%s1635_s12 + $0x10] sm:$0xff] %v867_v17  ;;  %872 = vst [vmem:[%s1635_s12 + $0x18] sm:$0xff] %v868_v0 }

</bundles_post_ra>
